<compile_context>
chip_gen: v7x
topology: tpu7x:2x2x1
jax: 0.10.0
libtpu: 0.0.40
codegen_flags: <defaults>
</compile_context>

<pallas_src>
import functools

import jax
import jax.numpy as jnp
from jax.experimental import pallas as pl
from jax.experimental.pallas import tpu as pltpu


def _round_up(x, m):
    return ((x + m - 1) // m) * m


@functools.lru_cache(maxsize=None)
def _scoped_vmem_limit():
    """Per-generation scoped-VMEM cap (leaves headroom for compiler scratch)."""
    phys = None
    try:
        phys = int(pltpu.get_tpu_info().vmem_capacity_bytes)
    except Exception:
        phys = None
    if not phys:
        try:
            kind = jax.devices()[0].device_kind.lower()
            phys = 64 * 2**20 if "v7" in kind else 128 * 2**20
        except Exception:
            phys = 64 * 2**20
    return int(min(48 * 2**20, max(24 * 2**20, phys * 5 // 8)))


# ---------------------------------------------------------------------------
# Fused 3x3 / stride-2 / pad-1 conv kernel (phase-grid formulation)
# ---------------------------------------------------------------------------
def _fused_conv_kernel(p00_ref, p01_ref, p10_ref, p11_ref, w_ref, o_ref, *,
                       ho, wo, apply_lrelu, slope):
    """One batch image x one Cout tile.

    p{a}{b}_ref : (1, (ho+2)*(wo+1), Cin) flattened stride-2 parity grid of the
                  zero-padded input (row parity a, col parity b).
    w_ref       : (3, 3, Cin, tn)
    o_ref       : (1, ho*(wo+1), tn)  -- "extended" output; one junk column per
                  output row is dropped by the wrapper.

    Every tap of the 3x3 window is a contiguous 2-D row-slice of one phase at
    a static offset, so the kernel needs no in-kernel reshapes or gathers.
    """
    phases = (p00_ref, p01_ref, p10_ref, p11_ref)
    wx = wo + 1
    m_ext = ho * wx
    tn = w_ref.shape[3]

    acc = jnp.zeros((m_ext, tn), jnp.float32)
    for kh in range(3):
        for kw in range(3):
            p_ref = phases[(kh & 1) * 2 + (kw & 1)]
            off = (kh // 2) * wx + (kw // 2)          # static offset
            tap = p_ref[0, off:off + m_ext, :]        # (m_ext, Cin)
            acc = acc + jnp.dot(tap, w_ref[kh, kw, :, :],
                                preferred_element_type=jnp.float32)
    if apply_lrelu:
        acc = jnp.where(acc >= 0, acc, slope * acc)
    o_ref[0] = acc.astype(o_ref.dtype)


def _conv_fused(x_nhwc, w_k, *, apply_lrelu, slope, out_dtype, vmem_limit):
    """Fused conv path (whole image per grid step). Returns None if it would
    not fit in VMEM (caller falls back to the im2col matmul path)."""
    N, H, W, C = x_nhwc.shape
    Cout = w_k.shape[-1]
    Ho = (H - 1) // 2 + 1
    Wo = (W - 1) // 2 + 1
    Wx = Wo + 1                      # extended output width
    L = (Ho + 2) * Wx                # flattened phase length
    m_ext = Ho * Wx

    # Cout tiling: no channel padding when Cout fits one tile; prefer 256/512
    # wide tiles for the 256-wide v6e/v7x MXUs when Cout is large.
    if Cout <= 512:
        tn = Cout
    elif Cout % 512 == 0:
        tn = 512
    elif Cout % 256 == 0:
        tn = 256
    elif Cout % 128 == 0:
        tn = 128
    else:
        return None
    n_j = Cout // tn

    in_b = x_nhwc.dtype.itemsize
    out_b = jnp.dtype(out_dtype).itemsize
    need = (2 * (4 * L * C * in_b + 9 * C * tn * in_b + m_ext * tn * out_b)
            + m_ext * tn * 4 + (4 << 20))
    if need > vmem_limit:
        return None

    # Stride-2 parity grids of the zero-padded input (~1x activation bytes vs.
    # the 9x im2col blow-up), flattened for the static-offset tap trick.
    # TODO(synk): halo-tiled manual DMA of input row bands would avoid even
    # this single phase-materialization pass and scale to huge feature maps.
    xp = jnp.pad(x_nhwc, ((0, 0), (1, 4), (1, 2), (0, 0)))
    phases = [
        xp[:, a:a + 2 * (Ho + 2) - 1:2, b:b + 2 * Wx - 1:2, :].reshape(N, L, C)
        for a in (0, 1) for b in (0, 1)
    ]

    kernel = functools.partial(_fused_conv_kernel, ho=Ho, wo=Wo,
                               apply_lrelu=apply_lrelu, slope=slope)
    flops = 2 * N * m_ext * 9 * C * Cout
    bytes_accessed = (4 * N * L * C * in_b + 9 * C * Cout * in_b
                      + N * m_ext * Cout * out_b)
    phase_spec = pl.BlockSpec((1, L, C), lambda n, j: (n, 0, 0))

    out = pl.pallas_call(
        kernel,
        grid=(N, n_j),
        in_specs=[phase_spec] * 4 + [
            pl.BlockSpec((3, 3, C, tn), lambda n, j: (0, 0, 0, j))],
        out_specs=pl.BlockSpec((1, m_ext, tn), lambda n, j: (n, 0, j)),
        out_shape=jax.ShapeDtypeStruct((N, m_ext, Cout), out_dtype),
        compiler_params=pltpu.CompilerParams(
            dimension_semantics=("parallel", "parallel"),
            vmem_limit_bytes=vmem_limit),
        cost_estimate=pl.CostEstimate(flops=flops, transcendentals=0,
                                      bytes_accessed=bytes_accessed),
    )(*phases, w_k)
    # Drop the junk column introduced by the extended-width formulation.
    return out.reshape(N, Ho, Wx, Cout)[:, :, :Wo, :]


# ---------------------------------------------------------------------------
# Fallback: im2col + tiled matmul (only for very large feature maps)
# ---------------------------------------------------------------------------
def _matmul_kernel(a_ref, b_ref, o_ref, acc_ref, *, apply_lrelu, slope):
    @pl.when(pl.program_id(2) == 0)
    def _():
        acc_ref[...] = jnp.zeros_like(acc_ref)

    acc_ref[...] += jnp.dot(a_ref[...], b_ref[...],
                            preferred_element_type=jnp.float32)

    @pl.when(pl.program_id(2) == pl.num_programs(2) - 1)
    def _():
        y = acc_ref[...]
        if apply_lrelu:
            y = jnp.where(y >= 0, y, slope * y)
        o_ref[...] = y.astype(o_ref.dtype)


def _largest_tile(total_units, max_units):
    best = 1
    for d in range(1, total_units + 1):
        if total_units % d == 0 and d <= max_units:
            best = d
    return best


def _pallas_matmul(a, b, *, apply_lrelu, slope, out_dtype, vmem_limit):
    """a: (M, K) x b: (K, N) -> (M, N). bf16 operands, f32 accumulation."""
    M, K = a.shape
    K2, Nc = b.shape
    assert K == K2

    # K padded only to lane width (no tk-multiple overshoot); weights stay
    # full-K resident in VMEM whenever Kp <= 4096.
    Kp = _round_up(K, 128)
    tk = Kp if Kp <= 4096 else 128 * _largest_tile(Kp // 128, 4096 // 128)
    tm = min(512, _round_up(M, 16))
    tn = min(512, _round_up(Nc, 128))
    Mp, Np = _round_up(M, tm), _round_up(Nc, tn)

    # TODO(synk): fold these pads into the im2col construction itself.
    a_p = a if (Mp == M and Kp == K) else jnp.pad(a, ((0, Mp - M), (0, Kp - K)))
    b_p = b if (Kp == K and Np == Nc) else jnp.pad(b, ((0, Kp - K), (0, Np - Nc)))

    in_b = a_p.dtype.itemsize
    out_b = jnp.dtype(out_dtype).itemsize
    flops = 2 * M * K * Nc
    bytes_accessed = (Mp * Kp + Kp * Np) * in_b + Mp * Np * out_b

    kernel = functools.partial(_matmul_kernel, apply_lrelu=apply_lrelu,
                               slope=slope)
    out = pl.pallas_call(
        kernel,
        grid=(Mp // tm, Np // tn, Kp // tk),
        in_specs=[
            pl.BlockSpec((tm, tk), lambda i, j, k: (i, k)),
            pl.BlockSpec((tk, tn), lambda i, j, k: (k, j)),
        ],
        out_specs=pl.BlockSpec((tm, tn), lambda i, j, k: (i, j)),
        out_shape=jax.ShapeDtypeStruct((Mp, Np), out_dtype),
        scratch_shapes=[pltpu.VMEM((tm, tn), jnp.float32)],
        compiler_params=pltpu.CompilerParams(
            dimension_semantics=("parallel", "parallel", "arbitrary"),
            vmem_limit_bytes=vmem_limit),
        cost_estimate=pl.CostEstimate(flops=flops, transcendentals=0,
                                      bytes_accessed=bytes_accessed),
    )(a_p, b_p)
    return out[:M, :Nc]


def _im2col_nhwc(x_nhwc, k=3, s=2, p=1):
    """im2col for stride-2, pad-1, 3x3 conv on NHWC input.
    Returns (N*Ho*Wo, 9*C) with column index = (kh*3 + kw)*C + c."""
    N, H, W, C = x_nhwc.shape
    Ho = (H + 2 * p - k) // s + 1
    Wo = (W + 2 * p - k) // s + 1
    xp = jnp.pad(x_nhwc, ((0, 0), (p, p), (p, p), (0, 0)))
    taps = [xp[:, kh:kh + s * Ho:s, kw:kw + s * Wo:s, :]
            for kh in range(k) for kw in range(k)]
    col = jnp.stack(taps, axis=3).reshape(N * Ho * Wo, k * k * C)
    return col, Ho, Wo


# ---------------------------------------------------------------------------
# Conv dispatcher
# ---------------------------------------------------------------------------
def conv2d_s2p1_nhwc(x_nhwc, w_oihw, *, apply_lrelu=False, slope=0.2,
                     out_dtype=jnp.bfloat16):
    """Conv2d(3x3, stride=2, pad=1, bias=False); NHWC in -> NHWC out."""
    N, H, W, C = x_nhwc.shape
    Cout, Cin, kh, kw = w_oihw.shape
    assert Cin == C and kh == 3 and kw == 3

    vmem_limit = _scoped_vmem_limit()
    x_bf = x_nhwc.astype(jnp.bfloat16)
    w_k = jnp.transpose(w_oihw, (2, 3, 1, 0)).astype(jnp.bfloat16)  # (3,3,Ci,Co)

    y = _conv_fused(x_bf, w_k, apply_lrelu=apply_lrelu, slope=slope,
                    out_dtype=out_dtype, vmem_limit=vmem_limit)
    if y is not None:
        return y

    # Feature map too large for whole-image VMEM blocking: im2col + matmul.
    # TODO(synk): replace with a halo-tiled manual-DMA conv that streams input
    # row bands so the 9x col matrix is never materialized in HBM.
    col, Ho, Wo = _im2col_nhwc(x_bf)
    w_col = w_k.reshape(9 * Cin, Cout)
    y = _pallas_matmul(col, w_col, apply_lrelu=apply_lrelu, slope=slope,
                       out_dtype=out_dtype, vmem_limit=vmem_limit)
    return y.reshape(N, Ho, Wo, Cout)


# ---------------------------------------------------------------------------
# InstanceNorm2d (affine=False, eps=1e-5) + LeakyReLU(0.2), NHWC layout
# ---------------------------------------------------------------------------
def _instnorm_lrelu_kernel(x_ref, o_ref, *, eps, slope):
    # x: (1, HW, tc) block: one image x one channel tile. Channels on lanes,
    # spatial reduction across sublanes. f32 math, biased variance (matches
    # nn.InstanceNorm2d defaults, affine=False).
    x = x_ref[...].astype(jnp.float32)
    mean = jnp.mean(x, axis=1, keepdims=True)
    centered = x - mean
    var = jnp.mean(centered * centered, axis=1, keepdims=True)
    y = centered * jax.lax.rsqrt(var + eps)
    o_ref[...] = jnp.where(y >= 0, y, slope * y).astype(o_ref.dtype)


def instance_norm_leaky_relu_nhwc(y_nhwc, eps=1e-5, slope=0.2,
                                  out_dtype=jnp.float32):
    N, Ho, Wo, C = y_nhwc.shape
    HW = Ho * Wo
    x = y_nhwc.reshape(N, HW, C)

    in_b = x.dtype.itemsize
    out_b = jnp.dtype(out_dtype).itemsize
    cap = _scoped_vmem_limit()
    budget = min(12 << 20, cap // 3)   # conservative: fits v5e defaults too

    def _fits(tc):
        return 2 * HW * tc * (in_b + out_b) + (2 << 20) <= budget

    tc = C
    if not _fits(tc):
        cands = [m for m in range(128, C, 128) if C % m == 0 and _fits(m)]
        if cands:
            tc = max(cands)
        elif C % 128 == 0:
            tc = 128
        # else keep tc = C (single pass; see TODO)
    # TODO(synk): two-pass (sum / sum-of-squares over a spatial grid axis)
    # reduction for very large H*W where even a 128-channel tile exceeds VMEM.

    needed = 2 * HW * tc * (in_b + out_b) + (4 << 20)
    vmem_limit = int(min(max(needed, 16 << 20), cap))
    kernel = functools.partial(_instnorm_lrelu_kernel, eps=eps, slope=slope)
    out = pl.pallas_call(
        kernel,
        grid=(N, C // tc),
        in_specs=[pl.BlockSpec((1, HW, tc), lambda n, j: (n, 0, j))],
        out_specs=pl.BlockSpec((1, HW, tc), lambda n, j: (n, 0, j)),
        out_shape=jax.ShapeDtypeStruct((N, HW, C), out_dtype),
        compiler_params=pltpu.CompilerParams(
            dimension_semantics=("parallel", "parallel"),
            vmem_limit_bytes=vmem_limit),
    )(x)
    return out.reshape(N, Ho, Wo, C)


# ---------------------------------------------------------------------------
# UNetDown forward
# ---------------------------------------------------------------------------
def unet_down_forward(x_nchw, params, normalize=True):
    """conv -> conv -> conv -> [InstanceNorm] -> LeakyReLU (all in NHWC)."""
    # Single NCHW->NHWC transpose at the input; bf16 activations between convs
    # (f32 accumulation inside the kernels).
    x = jnp.transpose(x_nchw.astype(jnp.bfloat16), (0, 2, 3, 1))
    y = conv2d_s2p1_nhwc(x, params["w1"], out_dtype=jnp.bfloat16)
    y = conv2d_s2p1_nhwc(y, params["w2"], out_dtype=jnp.bfloat16)
    if normalize:
        y = conv2d_s2p1_nhwc(y, params["w3"], out_dtype=jnp.bfloat16)
        y = instance_norm_leaky_relu_nhwc(y, eps=1e-5, slope=0.2)
    else:
        # No norm: the final LeakyReLU is fused into conv3's epilogue.
        y = conv2d_s2p1_nhwc(y, params["w3"], apply_lrelu=True, slope=0.2,
                             out_dtype=jnp.float32)
    return jnp.transpose(y, (0, 3, 1, 2))      # single NHWC->NCHW transpose


def init_params(key, in_size, out_size):
    # Deterministic synthetic init (not matching torch's kaiming_uniform).
    k1, k2, k3 = jax.random.split(key, 3)
    shape = (out_size, in_size, 3, 3)
    return {
        "w1": 0.1 * jax.random.normal(k1, shape, dtype=jnp.float32),
        "w2": 0.1 * jax.random.normal(k2, shape, dtype=jnp.float32),
        "w3": 0.1 * jax.random.normal(k3, shape, dtype=jnp.float32),
    }


if __name__ == "__main__":
    key = jax.random.PRNGKey(0)
    kx, kp = jax.random.split(key)

    in_size = out_size = 4          # must be equal (see NOTE above)
    N, H, W = 2, 16, 16
    x = jax.random.normal(kx, (N, in_size, H, W), dtype=jnp.float32)
    params = init_params(kp, in_size, out_size)

    fwd = jax.jit(functools.partial(unet_down_forward, normalize=True))
    y = jax.block_until_ready(fwd(x, params))

    assert y.shape == (N, out_size, H // 8, W // 8), y.shape
    assert jnp.all(jnp.isfinite(y))
    print("KERNEL_OK")
</pallas_src>

<mosaic_0001>
module attributes {stable_mosaic.version = 11 : i64} {
  func.func @_fused_conv_kernel(%arg0: i32, %arg1: i32, %arg2: memref<1x90x4xbf16, #tpu.memory_space<vmem>>, %arg3: memref<1x90x4xbf16, #tpu.memory_space<vmem>>, %arg4: memref<1x90x4xbf16, #tpu.memory_space<vmem>>, %arg5: memref<1x90x4xbf16, #tpu.memory_space<vmem>>, %arg6: memref<3x3x4x4xbf16, #tpu.memory_space<vmem>>, %arg7: memref<1x72x4xbf16, #tpu.memory_space<vmem>>) attributes {dimension_semantics = [#tpu.dimension_semantics<parallel>, #tpu.dimension_semantics<parallel>], iteration_bounds = array<i64: 2, 1>, scalar_prefetch = 0 : i64, scratch_operands = 0 : i64, tpu.core_type = #tpu.core_type<tc>, window_params = [{transform_indices = @transform_0, window_bounds = array<i64: 1, 90, 4>}, {transform_indices = @transform_1, window_bounds = array<i64: 1, 90, 4>}, {transform_indices = @transform_2, window_bounds = array<i64: 1, 90, 4>}, {transform_indices = @transform_3, window_bounds = array<i64: 1, 90, 4>}, {transform_indices = @transform_4, window_bounds = array<i64: 3, 3, 4, 4>}, {transform_indices = @transform_5, window_bounds = array<i64: 1, 72, 4>}]} {
    %cst = arith.constant 0.000000e+00 : f32
    %0 = vector.broadcast %cst : f32 to vector<72x4xf32>
    %c0 = arith.constant 0 : index
    %c0_0 = arith.constant 0 : index
    %c0_1 = arith.constant 0 : index
    %1 = vector.load %arg2[%c0, %c0_0, %c0_1] : memref<1x90x4xbf16, #tpu.memory_space<vmem>>, vector<1x72x4xbf16>
    %2 = vector.shape_cast %1 : vector<1x72x4xbf16> to vector<72x4xbf16>
    %c0_2 = arith.constant 0 : index
    %c0_3 = arith.constant 0 : index
    %c0_4 = arith.constant 0 : index
    %c0_5 = arith.constant 0 : index
    %3 = vector.load %arg6[%c0_2, %c0_3, %c0_4, %c0_5] : memref<3x3x4x4xbf16, #tpu.memory_space<vmem>>, vector<1x1x4x4xbf16>
    %4 = vector.shape_cast %3 : vector<1x1x4x4xbf16> to vector<4x4xbf16>
    %cst_6 = arith.constant dense<0.000000e+00> : vector<72x4xf32>
    %5 = tpu.matmul %2, %4, %cst_6 {dimension_numbers = #tpu.dot_dimension_numbers<[1], [0], [0], [1], [0, 0, 1, 1], [], []>} : vector<72x4xbf16>, vector<4x4xbf16>, vector<72x4xf32> -> vector<72x4xf32>
    %6 = arith.addf %0, %5 : vector<72x4xf32>
    %c0_7 = arith.constant 0 : index
    %c0_8 = arith.constant 0 : index
    %c0_9 = arith.constant 0 : index
    %7 = vector.load %arg3[%c0_7, %c0_8, %c0_9] : memref<1x90x4xbf16, #tpu.memory_space<vmem>>, vector<1x72x4xbf16>
    %8 = vector.shape_cast %7 : vector<1x72x4xbf16> to vector<72x4xbf16>
    %c0_10 = arith.constant 0 : index
    %c1 = arith.constant 1 : index
    %c0_11 = arith.constant 0 : index
    %c0_12 = arith.constant 0 : index
    %9 = vector.load %arg6[%c0_10, %c1, %c0_11, %c0_12] : memref<3x3x4x4xbf16, #tpu.memory_space<vmem>>, vector<1x1x4x4xbf16>
    %10 = vector.shape_cast %9 : vector<1x1x4x4xbf16> to vector<4x4xbf16>
    %cst_13 = arith.constant dense<0.000000e+00> : vector<72x4xf32>
    %11 = tpu.matmul %8, %10, %cst_13 {dimension_numbers = #tpu.dot_dimension_numbers<[1], [0], [0], [1], [0, 0, 1, 1], [], []>} : vector<72x4xbf16>, vector<4x4xbf16>, vector<72x4xf32> -> vector<72x4xf32>
    %12 = arith.addf %6, %11 : vector<72x4xf32>
    %c0_14 = arith.constant 0 : index
    %c1_15 = arith.constant 1 : index
    %c0_16 = arith.constant 0 : index
    %13 = vector.load %arg2[%c0_14, %c1_15, %c0_16] : memref<1x90x4xbf16, #tpu.memory_space<vmem>>, vector<1x72x4xbf16>
    %14 = vector.shape_cast %13 : vector<1x72x4xbf16> to vector<72x4xbf16>
    %c0_17 = arith.constant 0 : index
    %c2 = arith.constant 2 : index
    %c0_18 = arith.constant 0 : index
    %c0_19 = arith.constant 0 : index
    %15 = vector.load %arg6[%c0_17, %c2, %c0_18, %c0_19] : memref<3x3x4x4xbf16, #tpu.memory_space<vmem>>, vector<1x1x4x4xbf16>
    %16 = vector.shape_cast %15 : vector<1x1x4x4xbf16> to vector<4x4xbf16>
    %cst_20 = arith.constant dense<0.000000e+00> : vector<72x4xf32>
    %17 = tpu.matmul %14, %16, %cst_20 {dimension_numbers = #tpu.dot_dimension_numbers<[1], [0], [0], [1], [0, 0, 1, 1], [], []>} : vector<72x4xbf16>, vector<4x4xbf16>, vector<72x4xf32> -> vector<72x4xf32>
    %18 = arith.addf %12, %17 : vector<72x4xf32>
    %c0_21 = arith.constant 0 : index
    %c0_22 = arith.constant 0 : index
    %c0_23 = arith.constant 0 : index
    %19 = vector.load %arg4[%c0_21, %c0_22, %c0_23] : memref<1x90x4xbf16, #tpu.memory_space<vmem>>, vector<1x72x4xbf16>
    %20 = vector.shape_cast %19 : vector<1x72x4xbf16> to vector<72x4xbf16>
    %c1_24 = arith.constant 1 : index
    %c0_25 = arith.constant 0 : index
    %c0_26 = arith.constant 0 : index
    %c0_27 = arith.constant 0 : index
    %21 = vector.load %arg6[%c1_24, %c0_25, %c0_26, %c0_27] : memref<3x3x4x4xbf16, #tpu.memory_space<vmem>>, vector<1x1x4x4xbf16>
    %22 = vector.shape_cast %21 : vector<1x1x4x4xbf16> to vector<4x4xbf16>
    %cst_28 = arith.constant dense<0.000000e+00> : vector<72x4xf32>
    %23 = tpu.matmul %20, %22, %cst_28 {dimension_numbers = #tpu.dot_dimension_numbers<[1], [0], [0], [1], [0, 0, 1, 1], [], []>} : vector<72x4xbf16>, vector<4x4xbf16>, vector<72x4xf32> -> vector<72x4xf32>
    %24 = arith.addf %18, %23 : vector<72x4xf32>
    %c0_29 = arith.constant 0 : index
    %c0_30 = arith.constant 0 : index
    %c0_31 = arith.constant 0 : index
    %25 = vector.load %arg5[%c0_29, %c0_30, %c0_31] : memref<1x90x4xbf16, #tpu.memory_space<vmem>>, vector<1x72x4xbf16>
    %26 = vector.shape_cast %25 : vector<1x72x4xbf16> to vector<72x4xbf16>
    %c1_32 = arith.constant 1 : index
    %c1_33 = arith.constant 1 : index
    %c0_34 = arith.constant 0 : index
    %c0_35 = arith.constant 0 : index
    %27 = vector.load %arg6[%c1_32, %c1_33, %c0_34, %c0_35] : memref<3x3x4x4xbf16, #tpu.memory_space<vmem>>, vector<1x1x4x4xbf16>
    %28 = vector.shape_cast %27 : vector<1x1x4x4xbf16> to vector<4x4xbf16>
    %cst_36 = arith.constant dense<0.000000e+00> : vector<72x4xf32>
    %29 = tpu.matmul %26, %28, %cst_36 {dimension_numbers = #tpu.dot_dimension_numbers<[1], [0], [0], [1], [0, 0, 1, 1], [], []>} : vector<72x4xbf16>, vector<4x4xbf16>, vector<72x4xf32> -> vector<72x4xf32>
    %30 = arith.addf %24, %29 : vector<72x4xf32>
    %c0_37 = arith.constant 0 : index
    %c1_38 = arith.constant 1 : index
    %c0_39 = arith.constant 0 : index
    %31 = vector.load %arg4[%c0_37, %c1_38, %c0_39] : memref<1x90x4xbf16, #tpu.memory_space<vmem>>, vector<1x72x4xbf16>
    %32 = vector.shape_cast %31 : vector<1x72x4xbf16> to vector<72x4xbf16>
    %c1_40 = arith.constant 1 : index
    %c2_41 = arith.constant 2 : index
    %c0_42 = arith.constant 0 : index
    %c0_43 = arith.constant 0 : index
    %33 = vector.load %arg6[%c1_40, %c2_41, %c0_42, %c0_43] : memref<3x3x4x4xbf16, #tpu.memory_space<vmem>>, vector<1x1x4x4xbf16>
    %34 = vector.shape_cast %33 : vector<1x1x4x4xbf16> to vector<4x4xbf16>
    %cst_44 = arith.constant dense<0.000000e+00> : vector<72x4xf32>
    %35 = tpu.matmul %32, %34, %cst_44 {dimension_numbers = #tpu.dot_dimension_numbers<[1], [0], [0], [1], [0, 0, 1, 1], [], []>} : vector<72x4xbf16>, vector<4x4xbf16>, vector<72x4xf32> -> vector<72x4xf32>
    %36 = arith.addf %30, %35 : vector<72x4xf32>
    %c0_45 = arith.constant 0 : index
    %c9 = arith.constant 9 : index
    %c0_46 = arith.constant 0 : index
    %37 = vector.load %arg2[%c0_45, %c9, %c0_46] : memref<1x90x4xbf16, #tpu.memory_space<vmem>>, vector<1x72x4xbf16>
    %38 = vector.shape_cast %37 : vector<1x72x4xbf16> to vector<72x4xbf16>
    %c2_47 = arith.constant 2 : index
    %c0_48 = arith.constant 0 : index
    %c0_49 = arith.constant 0 : index
    %c0_50 = arith.constant 0 : index
    %39 = vector.load %arg6[%c2_47, %c0_48, %c0_49, %c0_50] : memref<3x3x4x4xbf16, #tpu.memory_space<vmem>>, vector<1x1x4x4xbf16>
    %40 = vector.shape_cast %39 : vector<1x1x4x4xbf16> to vector<4x4xbf16>
    %cst_51 = arith.constant dense<0.000000e+00> : vector<72x4xf32>
    %41 = tpu.matmul %38, %40, %cst_51 {dimension_numbers = #tpu.dot_dimension_numbers<[1], [0], [0], [1], [0, 0, 1, 1], [], []>} : vector<72x4xbf16>, vector<4x4xbf16>, vector<72x4xf32> -> vector<72x4xf32>
    %42 = arith.addf %36, %41 : vector<72x4xf32>
    %c0_52 = arith.constant 0 : index
    %c9_53 = arith.constant 9 : index
    %c0_54 = arith.constant 0 : index
    %43 = vector.load %arg3[%c0_52, %c9_53, %c0_54] : memref<1x90x4xbf16, #tpu.memory_space<vmem>>, vector<1x72x4xbf16>
    %44 = vector.shape_cast %43 : vector<1x72x4xbf16> to vector<72x4xbf16>
    %c2_55 = arith.constant 2 : index
    %c1_56 = arith.constant 1 : index
    %c0_57 = arith.constant 0 : index
    %c0_58 = arith.constant 0 : index
    %45 = vector.load %arg6[%c2_55, %c1_56, %c0_57, %c0_58] : memref<3x3x4x4xbf16, #tpu.memory_space<vmem>>, vector<1x1x4x4xbf16>
    %46 = vector.shape_cast %45 : vector<1x1x4x4xbf16> to vector<4x4xbf16>
    %cst_59 = arith.constant dense<0.000000e+00> : vector<72x4xf32>
    %47 = tpu.matmul %44, %46, %cst_59 {dimension_numbers = #tpu.dot_dimension_numbers<[1], [0], [0], [1], [0, 0, 1, 1], [], []>} : vector<72x4xbf16>, vector<4x4xbf16>, vector<72x4xf32> -> vector<72x4xf32>
    %48 = arith.addf %42, %47 : vector<72x4xf32>
    %c0_60 = arith.constant 0 : index
    %c10 = arith.constant 10 : index
    %c0_61 = arith.constant 0 : index
    %49 = vector.load %arg2[%c0_60, %c10, %c0_61] : memref<1x90x4xbf16, #tpu.memory_space<vmem>>, vector<1x72x4xbf16>
    %50 = vector.shape_cast %49 : vector<1x72x4xbf16> to vector<72x4xbf16>
    %c2_62 = arith.constant 2 : index
    %c2_63 = arith.constant 2 : index
    %c0_64 = arith.constant 0 : index
    %c0_65 = arith.constant 0 : index
    %51 = vector.load %arg6[%c2_62, %c2_63, %c0_64, %c0_65] : memref<3x3x4x4xbf16, #tpu.memory_space<vmem>>, vector<1x1x4x4xbf16>
    %52 = vector.shape_cast %51 : vector<1x1x4x4xbf16> to vector<4x4xbf16>
    %cst_66 = arith.constant dense<0.000000e+00> : vector<72x4xf32>
    %53 = tpu.matmul %50, %52, %cst_66 {dimension_numbers = #tpu.dot_dimension_numbers<[1], [0], [0], [1], [0, 0, 1, 1], [], []>} : vector<72x4xbf16>, vector<4x4xbf16>, vector<72x4xf32> -> vector<72x4xf32>
    %54 = arith.addf %48, %53 : vector<72x4xf32>
    %55 = arith.truncf %54 : vector<72x4xf32> to vector<72x4xbf16>
    %c0_67 = arith.constant 0 : index
    %c0_68 = arith.constant 0 : index
    %c0_69 = arith.constant 0 : index
    %56 = vector.load %arg7[%c0_67, %c0_68, %c0_69] : memref<1x72x4xbf16, #tpu.memory_space<vmem>>, vector<1x72x4xbf16>
    %57 = vector.shape_cast %56 : vector<1x72x4xbf16> to vector<72x4xbf16>
    %58 = vector.shape_cast %55 : vector<72x4xbf16> to vector<1x72x4xbf16>
    tpu.vector_store %arg7[%c0_67, %c0_68, %c0_69], %58 {strides = array<i32>} : memref<1x72x4xbf16, #tpu.memory_space<vmem>>, vector<1x72x4xbf16>,
    return
  }
  func.func @transform_0(%arg0: i32, %arg1: i32) -> (i32, i32, i32) {
    %c0_i32 = arith.constant 0 : i32
    %c0_i32_0 = arith.constant 0 : i32
    %c0_i32_1 = arith.constant 0 : i32
    return %arg0, %c0_i32, %c0_i32_0 : i32, i32, i32
  }
  func.func @transform_1(%arg0: i32, %arg1: i32) -> (i32, i32, i32) {
    %c0_i32 = arith.constant 0 : i32
    %c0_i32_0 = arith.constant 0 : i32
    %c0_i32_1 = arith.constant 0 : i32
    return %arg0, %c0_i32, %c0_i32_0 : i32, i32, i32
  }
  func.func @transform_2(%arg0: i32, %arg1: i32) -> (i32, i32, i32) {
    %c0_i32 = arith.constant 0 : i32
    %c0_i32_0 = arith.constant 0 : i32
    %c0_i32_1 = arith.constant 0 : i32
    return %arg0, %c0_i32, %c0_i32_0 : i32, i32, i32
  }
  func.func @transform_3(%arg0: i32, %arg1: i32) -> (i32, i32, i32) {
    %c0_i32 = arith.constant 0 : i32
    %c0_i32_0 = arith.constant 0 : i32
    %c0_i32_1 = arith.constant 0 : i32
    return %arg0, %c0_i32, %c0_i32_0 : i32, i32, i32
  }
  func.func @transform_4(%arg0: i32, %arg1: i32) -> (i32, i32, i32, i32) {
    %c0_i32 = arith.constant 0 : i32
    %c0_i32_0 = arith.constant 0 : i32
    %c0_i32_1 = arith.constant 0 : i32
    %c0_i32_2 = arith.constant 0 : i32
    return %c0_i32, %c0_i32_0, %c0_i32_1, %arg1 : i32, i32, i32, i32
  }
  func.func @transform_5(%arg0: i32, %arg1: i32) -> (i32, i32, i32) {
    %c0_i32 = arith.constant 0 : i32
    %c0_i32_0 = arith.constant 0 : i32
    return %arg0, %c0_i32, %arg1 : i32, i32, i32
  }
}

module attributes {stable_mosaic.version = 11 : i64} {
  func.func @_fused_conv_kernel(%arg0: i32, %arg1: i32, %arg2: memref<1x30x4xbf16, #tpu.memory_space<vmem>>, %arg3: memref<1x30x4xbf16, #tpu.memory_space<vmem>>, %arg4: memref<1x30x4xbf16, #tpu.memory_space<vmem>>, %arg5: memref<1x30x4xbf16, #tpu.memory_space<vmem>>, %arg6: memref<3x3x4x4xbf16, #tpu.memory_space<vmem>>, %arg7: memref<1x20x4xbf16, #tpu.memory_space<vmem>>) attributes {dimension_semantics = [#tpu.dimension_semantics<parallel>, #tpu.dimension_semantics<parallel>], iteration_bounds = array<i64: 2, 1>, scalar_prefetch = 0 : i64, scratch_operands = 0 : i64, tpu.core_type = #tpu.core_type<tc>, window_params = [{transform_indices = @transform_0, window_bounds = array<i64: 1, 30, 4>}, {transform_indices = @transform_1, window_bounds = array<i64: 1, 30, 4>}, {transform_indices = @transform_2, window_bounds = array<i64: 1, 30, 4>}, {transform_indices = @transform_3, window_bounds = array<i64: 1, 30, 4>}, {transform_indices = @transform_4, window_bounds = array<i64: 3, 3, 4, 4>}, {transform_indices = @transform_5, window_bounds = array<i64: 1, 20, 4>}]} {
    %cst = arith.constant 0.000000e+00 : f32
    %0 = vector.broadcast %cst : f32 to vector<20x4xf32>
    %c0 = arith.constant 0 : index
    %c0_0 = arith.constant 0 : index
    %c0_1 = arith.constant 0 : index
    %1 = vector.load %arg2[%c0, %c0_0, %c0_1] : memref<1x30x4xbf16, #tpu.memory_space<vmem>>, vector<1x20x4xbf16>
    %2 = vector.shape_cast %1 : vector<1x20x4xbf16> to vector<20x4xbf16>
    %c0_2 = arith.constant 0 : index
    %c0_3 = arith.constant 0 : index
    %c0_4 = arith.constant 0 : index
    %c0_5 = arith.constant 0 : index
    %3 = vector.load %arg6[%c0_2, %c0_3, %c0_4, %c0_5] : memref<3x3x4x4xbf16, #tpu.memory_space<vmem>>, vector<1x1x4x4xbf16>
    %4 = vector.shape_cast %3 : vector<1x1x4x4xbf16> to vector<4x4xbf16>
    %cst_6 = arith.constant dense<0.000000e+00> : vector<20x4xf32>
    %5 = tpu.matmul %2, %4, %cst_6 {dimension_numbers = #tpu.dot_dimension_numbers<[1], [0], [0], [1], [0, 0, 1, 1], [], []>} : vector<20x4xbf16>, vector<4x4xbf16>, vector<20x4xf32> -> vector<20x4xf32>
    %6 = arith.addf %0, %5 : vector<20x4xf32>
    %c0_7 = arith.constant 0 : index
    %c0_8 = arith.constant 0 : index
    %c0_9 = arith.constant 0 : index
    %7 = vector.load %arg3[%c0_7, %c0_8, %c0_9] : memref<1x30x4xbf16, #tpu.memory_space<vmem>>, vector<1x20x4xbf16>
    %8 = vector.shape_cast %7 : vector<1x20x4xbf16> to vector<20x4xbf16>
    %c0_10 = arith.constant 0 : index
    %c1 = arith.constant 1 : index
    %c0_11 = arith.constant 0 : index
    %c0_12 = arith.constant 0 : index
    %9 = vector.load %arg6[%c0_10, %c1, %c0_11, %c0_12] : memref<3x3x4x4xbf16, #tpu.memory_space<vmem>>, vector<1x1x4x4xbf16>
    %10 = vector.shape_cast %9 : vector<1x1x4x4xbf16> to vector<4x4xbf16>
    %cst_13 = arith.constant dense<0.000000e+00> : vector<20x4xf32>
    %11 = tpu.matmul %8, %10, %cst_13 {dimension_numbers = #tpu.dot_dimension_numbers<[1], [0], [0], [1], [0, 0, 1, 1], [], []>} : vector<20x4xbf16>, vector<4x4xbf16>, vector<20x4xf32> -> vector<20x4xf32>
    %12 = arith.addf %6, %11 : vector<20x4xf32>
    %c0_14 = arith.constant 0 : index
    %c1_15 = arith.constant 1 : index
    %c0_16 = arith.constant 0 : index
    %13 = vector.load %arg2[%c0_14, %c1_15, %c0_16] : memref<1x30x4xbf16, #tpu.memory_space<vmem>>, vector<1x20x4xbf16>
    %14 = vector.shape_cast %13 : vector<1x20x4xbf16> to vector<20x4xbf16>
    %c0_17 = arith.constant 0 : index
    %c2 = arith.constant 2 : index
    %c0_18 = arith.constant 0 : index
    %c0_19 = arith.constant 0 : index
    %15 = vector.load %arg6[%c0_17, %c2, %c0_18, %c0_19] : memref<3x3x4x4xbf16, #tpu.memory_space<vmem>>, vector<1x1x4x4xbf16>
    %16 = vector.shape_cast %15 : vector<1x1x4x4xbf16> to vector<4x4xbf16>
    %cst_20 = arith.constant dense<0.000000e+00> : vector<20x4xf32>
    %17 = tpu.matmul %14, %16, %cst_20 {dimension_numbers = #tpu.dot_dimension_numbers<[1], [0], [0], [1], [0, 0, 1, 1], [], []>} : vector<20x4xbf16>, vector<4x4xbf16>, vector<20x4xf32> -> vector<20x4xf32>
    %18 = arith.addf %12, %17 : vector<20x4xf32>
    %c0_21 = arith.constant 0 : index
    %c0_22 = arith.constant 0 : index
    %c0_23 = arith.constant 0 : index
    %19 = vector.load %arg4[%c0_21, %c0_22, %c0_23] : memref<1x30x4xbf16, #tpu.memory_space<vmem>>, vector<1x20x4xbf16>
    %20 = vector.shape_cast %19 : vector<1x20x4xbf16> to vector<20x4xbf16>
    %c1_24 = arith.constant 1 : index
    %c0_25 = arith.constant 0 : index
    %c0_26 = arith.constant 0 : index
    %c0_27 = arith.constant 0 : index
    %21 = vector.load %arg6[%c1_24, %c0_25, %c0_26, %c0_27] : memref<3x3x4x4xbf16, #tpu.memory_space<vmem>>, vector<1x1x4x4xbf16>
    %22 = vector.shape_cast %21 : vector<1x1x4x4xbf16> to vector<4x4xbf16>
    %cst_28 = arith.constant dense<0.000000e+00> : vector<20x4xf32>
    %23 = tpu.matmul %20, %22, %cst_28 {dimension_numbers = #tpu.dot_dimension_numbers<[1], [0], [0], [1], [0, 0, 1, 1], [], []>} : vector<20x4xbf16>, vector<4x4xbf16>, vector<20x4xf32> -> vector<20x4xf32>
    %24 = arith.addf %18, %23 : vector<20x4xf32>
    %c0_29 = arith.constant 0 : index
    %c0_30 = arith.constant 0 : index
    %c0_31 = arith.constant 0 : index
    %25 = vector.load %arg5[%c0_29, %c0_30, %c0_31] : memref<1x30x4xbf16, #tpu.memory_space<vmem>>, vector<1x20x4xbf16>
    %26 = vector.shape_cast %25 : vector<1x20x4xbf16> to vector<20x4xbf16>
    %c1_32 = arith.constant 1 : index
    %c1_33 = arith.constant 1 : index
    %c0_34 = arith.constant 0 : index
    %c0_35 = arith.constant 0 : index
    %27 = vector.load %arg6[%c1_32, %c1_33, %c0_34, %c0_35] : memref<3x3x4x4xbf16, #tpu.memory_space<vmem>>, vector<1x1x4x4xbf16>
    %28 = vector.shape_cast %27 : vector<1x1x4x4xbf16> to vector<4x4xbf16>
    %cst_36 = arith.constant dense<0.000000e+00> : vector<20x4xf32>
    %29 = tpu.matmul %26, %28, %cst_36 {dimension_numbers = #tpu.dot_dimension_numbers<[1], [0], [0], [1], [0, 0, 1, 1], [], []>} : vector<20x4xbf16>, vector<4x4xbf16>, vector<20x4xf32> -> vector<20x4xf32>
    %30 = arith.addf %24, %29 : vector<20x4xf32>
    %c0_37 = arith.constant 0 : index
    %c1_38 = arith.constant 1 : index
    %c0_39 = arith.constant 0 : index
    %31 = vector.load %arg4[%c0_37, %c1_38, %c0_39] : memref<1x30x4xbf16, #tpu.memory_space<vmem>>, vector<1x20x4xbf16>
    %32 = vector.shape_cast %31 : vector<1x20x4xbf16> to vector<20x4xbf16>
    %c1_40 = arith.constant 1 : index
    %c2_41 = arith.constant 2 : index
    %c0_42 = arith.constant 0 : index
    %c0_43 = arith.constant 0 : index
    %33 = vector.load %arg6[%c1_40, %c2_41, %c0_42, %c0_43] : memref<3x3x4x4xbf16, #tpu.memory_space<vmem>>, vector<1x1x4x4xbf16>
    %34 = vector.shape_cast %33 : vector<1x1x4x4xbf16> to vector<4x4xbf16>
    %cst_44 = arith.constant dense<0.000000e+00> : vector<20x4xf32>
    %35 = tpu.matmul %32, %34, %cst_44 {dimension_numbers = #tpu.dot_dimension_numbers<[1], [0], [0], [1], [0, 0, 1, 1], [], []>} : vector<20x4xbf16>, vector<4x4xbf16>, vector<20x4xf32> -> vector<20x4xf32>
    %36 = arith.addf %30, %35 : vector<20x4xf32>
    %c0_45 = arith.constant 0 : index
    %c5 = arith.constant 5 : index
    %c0_46 = arith.constant 0 : index
    %37 = vector.load %arg2[%c0_45, %c5, %c0_46] : memref<1x30x4xbf16, #tpu.memory_space<vmem>>, vector<1x20x4xbf16>
    %38 = vector.shape_cast %37 : vector<1x20x4xbf16> to vector<20x4xbf16>
    %c2_47 = arith.constant 2 : index
    %c0_48 = arith.constant 0 : index
    %c0_49 = arith.constant 0 : index
    %c0_50 = arith.constant 0 : index
    %39 = vector.load %arg6[%c2_47, %c0_48, %c0_49, %c0_50] : memref<3x3x4x4xbf16, #tpu.memory_space<vmem>>, vector<1x1x4x4xbf16>
    %40 = vector.shape_cast %39 : vector<1x1x4x4xbf16> to vector<4x4xbf16>
    %cst_51 = arith.constant dense<0.000000e+00> : vector<20x4xf32>
    %41 = tpu.matmul %38, %40, %cst_51 {dimension_numbers = #tpu.dot_dimension_numbers<[1], [0], [0], [1], [0, 0, 1, 1], [], []>} : vector<20x4xbf16>, vector<4x4xbf16>, vector<20x4xf32> -> vector<20x4xf32>
    %42 = arith.addf %36, %41 : vector<20x4xf32>
    %c0_52 = arith.constant 0 : index
    %c5_53 = arith.constant 5 : index
    %c0_54 = arith.constant 0 : index
    %43 = vector.load %arg3[%c0_52, %c5_53, %c0_54] : memref<1x30x4xbf16, #tpu.memory_space<vmem>>, vector<1x20x4xbf16>
    %44 = vector.shape_cast %43 : vector<1x20x4xbf16> to vector<20x4xbf16>
    %c2_55 = arith.constant 2 : index
    %c1_56 = arith.constant 1 : index
    %c0_57 = arith.constant 0 : index
    %c0_58 = arith.constant 0 : index
    %45 = vector.load %arg6[%c2_55, %c1_56, %c0_57, %c0_58] : memref<3x3x4x4xbf16, #tpu.memory_space<vmem>>, vector<1x1x4x4xbf16>
    %46 = vector.shape_cast %45 : vector<1x1x4x4xbf16> to vector<4x4xbf16>
    %cst_59 = arith.constant dense<0.000000e+00> : vector<20x4xf32>
    %47 = tpu.matmul %44, %46, %cst_59 {dimension_numbers = #tpu.dot_dimension_numbers<[1], [0], [0], [1], [0, 0, 1, 1], [], []>} : vector<20x4xbf16>, vector<4x4xbf16>, vector<20x4xf32> -> vector<20x4xf32>
    %48 = arith.addf %42, %47 : vector<20x4xf32>
    %c0_60 = arith.constant 0 : index
    %c6 = arith.constant 6 : index
    %c0_61 = arith.constant 0 : index
    %49 = vector.load %arg2[%c0_60, %c6, %c0_61] : memref<1x30x4xbf16, #tpu.memory_space<vmem>>, vector<1x20x4xbf16>
    %50 = vector.shape_cast %49 : vector<1x20x4xbf16> to vector<20x4xbf16>
    %c2_62 = arith.constant 2 : index
    %c2_63 = arith.constant 2 : index
    %c0_64 = arith.constant 0 : index
    %c0_65 = arith.constant 0 : index
    %51 = vector.load %arg6[%c2_62, %c2_63, %c0_64, %c0_65] : memref<3x3x4x4xbf16, #tpu.memory_space<vmem>>, vector<1x1x4x4xbf16>
    %52 = vector.shape_cast %51 : vector<1x1x4x4xbf16> to vector<4x4xbf16>
    %cst_66 = arith.constant dense<0.000000e+00> : vector<20x4xf32>
    %53 = tpu.matmul %50, %52, %cst_66 {dimension_numbers = #tpu.dot_dimension_numbers<[1], [0], [0], [1], [0, 0, 1, 1], [], []>} : vector<20x4xbf16>, vector<4x4xbf16>, vector<20x4xf32> -> vector<20x4xf32>
    %54 = arith.addf %48, %53 : vector<20x4xf32>
    %55 = arith.truncf %54 : vector<20x4xf32> to vector<20x4xbf16>
    %c0_67 = arith.constant 0 : index
    %c0_68 = arith.constant 0 : index
    %c0_69 = arith.constant 0 : index
    %56 = vector.load %arg7[%c0_67, %c0_68, %c0_69] : memref<1x20x4xbf16, #tpu.memory_space<vmem>>, vector<1x20x4xbf16>
    %57 = vector.shape_cast %56 : vector<1x20x4xbf16> to vector<20x4xbf16>
    %58 = vector.shape_cast %55 : vector<20x4xbf16> to vector<1x20x4xbf16>
    tpu.vector_store %arg7[%c0_67, %c0_68, %c0_69], %58 {strides = array<i32>} : memref<1x20x4xbf16, #tpu.memory_space<vmem>>, vector<1x20x4xbf16>,
    return
  }
  func.func @transform_0(%arg0: i32, %arg1: i32) -> (i32, i32, i32) {
    %c0_i32 = arith.constant 0 : i32
    %c0_i32_0 = arith.constant 0 : i32
    %c0_i32_1 = arith.constant 0 : i32
    return %arg0, %c0_i32, %c0_i32_0 : i32, i32, i32
  }
  func.func @transform_1(%arg0: i32, %arg1: i32) -> (i32, i32, i32) {
    %c0_i32 = arith.constant 0 : i32
    %c0_i32_0 = arith.constant 0 : i32
    %c0_i32_1 = arith.constant 0 : i32
    return %arg0, %c0_i32, %c0_i32_0 : i32, i32, i32
  }
  func.func @transform_2(%arg0: i32, %arg1: i32) -> (i32, i32, i32) {
    %c0_i32 = arith.constant 0 : i32
    %c0_i32_0 = arith.constant 0 : i32
    %c0_i32_1 = arith.constant 0 : i32
    return %arg0, %c0_i32, %c0_i32_0 : i32, i32, i32
  }
  func.func @transform_3(%arg0: i32, %arg1: i32) -> (i32, i32, i32) {
    %c0_i32 = arith.constant 0 : i32
    %c0_i32_0 = arith.constant 0 : i32
    %c0_i32_1 = arith.constant 0 : i32
    return %arg0, %c0_i32, %c0_i32_0 : i32, i32, i32
  }
  func.func @transform_4(%arg0: i32, %arg1: i32) -> (i32, i32, i32, i32) {
    %c0_i32 = arith.constant 0 : i32
    %c0_i32_0 = arith.constant 0 : i32
    %c0_i32_1 = arith.constant 0 : i32
    %c0_i32_2 = arith.constant 0 : i32
    return %c0_i32, %c0_i32_0, %c0_i32_1, %arg1 : i32, i32, i32, i32
  }
  func.func @transform_5(%arg0: i32, %arg1: i32) -> (i32, i32, i32) {
    %c0_i32 = arith.constant 0 : i32
    %c0_i32_0 = arith.constant 0 : i32
    return %arg0, %c0_i32, %arg1 : i32, i32, i32
  }
}

module attributes {stable_mosaic.version = 11 : i64} {
  func.func @_fused_conv_kernel(%arg0: i32, %arg1: i32, %arg2: memref<1x12x4xbf16, #tpu.memory_space<vmem>>, %arg3: memref<1x12x4xbf16, #tpu.memory_space<vmem>>, %arg4: memref<1x12x4xbf16, #tpu.memory_space<vmem>>, %arg5: memref<1x12x4xbf16, #tpu.memory_space<vmem>>, %arg6: memref<3x3x4x4xbf16, #tpu.memory_space<vmem>>, %arg7: memref<1x6x4xbf16, #tpu.memory_space<vmem>>) attributes {dimension_semantics = [#tpu.dimension_semantics<parallel>, #tpu.dimension_semantics<parallel>], iteration_bounds = array<i64: 2, 1>, scalar_prefetch = 0 : i64, scratch_operands = 0 : i64, tpu.core_type = #tpu.core_type<tc>, window_params = [{transform_indices = @transform_0, window_bounds = array<i64: 1, 12, 4>}, {transform_indices = @transform_1, window_bounds = array<i64: 1, 12, 4>}, {transform_indices = @transform_2, window_bounds = array<i64: 1, 12, 4>}, {transform_indices = @transform_3, window_bounds = array<i64: 1, 12, 4>}, {transform_indices = @transform_4, window_bounds = array<i64: 3, 3, 4, 4>}, {transform_indices = @transform_5, window_bounds = array<i64: 1, 6, 4>}]} {
    %cst = arith.constant 0.000000e+00 : f32
    %0 = vector.broadcast %cst : f32 to vector<6x4xf32>
    %c0 = arith.constant 0 : index
    %c0_0 = arith.constant 0 : index
    %c0_1 = arith.constant 0 : index
    %1 = vector.load %arg2[%c0, %c0_0, %c0_1] : memref<1x12x4xbf16, #tpu.memory_space<vmem>>, vector<1x6x4xbf16>
    %2 = vector.shape_cast %1 : vector<1x6x4xbf16> to vector<6x4xbf16>
    %c0_2 = arith.constant 0 : index
    %c0_3 = arith.constant 0 : index
    %c0_4 = arith.constant 0 : index
    %c0_5 = arith.constant 0 : index
    %3 = vector.load %arg6[%c0_2, %c0_3, %c0_4, %c0_5] : memref<3x3x4x4xbf16, #tpu.memory_space<vmem>>, vector<1x1x4x4xbf16>
    %4 = vector.shape_cast %3 : vector<1x1x4x4xbf16> to vector<4x4xbf16>
    %cst_6 = arith.constant dense<0.000000e+00> : vector<6x4xf32>
    %5 = tpu.matmul %2, %4, %cst_6 {dimension_numbers = #tpu.dot_dimension_numbers<[1], [0], [0], [1], [0, 0, 1, 1], [], []>} : vector<6x4xbf16>, vector<4x4xbf16>, vector<6x4xf32> -> vector<6x4xf32>
    %6 = arith.addf %0, %5 : vector<6x4xf32>
    %c0_7 = arith.constant 0 : index
    %c0_8 = arith.constant 0 : index
    %c0_9 = arith.constant 0 : index
    %7 = vector.load %arg3[%c0_7, %c0_8, %c0_9] : memref<1x12x4xbf16, #tpu.memory_space<vmem>>, vector<1x6x4xbf16>
    %8 = vector.shape_cast %7 : vector<1x6x4xbf16> to vector<6x4xbf16>
    %c0_10 = arith.constant 0 : index
    %c1 = arith.constant 1 : index
    %c0_11 = arith.constant 0 : index
    %c0_12 = arith.constant 0 : index
    %9 = vector.load %arg6[%c0_10, %c1, %c0_11, %c0_12] : memref<3x3x4x4xbf16, #tpu.memory_space<vmem>>, vector<1x1x4x4xbf16>
    %10 = vector.shape_cast %9 : vector<1x1x4x4xbf16> to vector<4x4xbf16>
    %cst_13 = arith.constant dense<0.000000e+00> : vector<6x4xf32>
    %11 = tpu.matmul %8, %10, %cst_13 {dimension_numbers = #tpu.dot_dimension_numbers<[1], [0], [0], [1], [0, 0, 1, 1], [], []>} : vector<6x4xbf16>, vector<4x4xbf16>, vector<6x4xf32> -> vector<6x4xf32>
    %12 = arith.addf %6, %11 : vector<6x4xf32>
    %c0_14 = arith.constant 0 : index
    %c1_15 = arith.constant 1 : index
    %c0_16 = arith.constant 0 : index
    %13 = vector.load %arg2[%c0_14, %c1_15, %c0_16] : memref<1x12x4xbf16, #tpu.memory_space<vmem>>, vector<1x6x4xbf16>
    %14 = vector.shape_cast %13 : vector<1x6x4xbf16> to vector<6x4xbf16>
    %c0_17 = arith.constant 0 : index
    %c2 = arith.constant 2 : index
    %c0_18 = arith.constant 0 : index
    %c0_19 = arith.constant 0 : index
    %15 = vector.load %arg6[%c0_17, %c2, %c0_18, %c0_19] : memref<3x3x4x4xbf16, #tpu.memory_space<vmem>>, vector<1x1x4x4xbf16>
    %16 = vector.shape_cast %15 : vector<1x1x4x4xbf16> to vector<4x4xbf16>
    %cst_20 = arith.constant dense<0.000000e+00> : vector<6x4xf32>
    %17 = tpu.matmul %14, %16, %cst_20 {dimension_numbers = #tpu.dot_dimension_numbers<[1], [0], [0], [1], [0, 0, 1, 1], [], []>} : vector<6x4xbf16>, vector<4x4xbf16>, vector<6x4xf32> -> vector<6x4xf32>
    %18 = arith.addf %12, %17 : vector<6x4xf32>
    %c0_21 = arith.constant 0 : index
    %c0_22 = arith.constant 0 : index
    %c0_23 = arith.constant 0 : index
    %19 = vector.load %arg4[%c0_21, %c0_22, %c0_23] : memref<1x12x4xbf16, #tpu.memory_space<vmem>>, vector<1x6x4xbf16>
    %20 = vector.shape_cast %19 : vector<1x6x4xbf16> to vector<6x4xbf16>
    %c1_24 = arith.constant 1 : index
    %c0_25 = arith.constant 0 : index
    %c0_26 = arith.constant 0 : index
    %c0_27 = arith.constant 0 : index
    %21 = vector.load %arg6[%c1_24, %c0_25, %c0_26, %c0_27] : memref<3x3x4x4xbf16, #tpu.memory_space<vmem>>, vector<1x1x4x4xbf16>
    %22 = vector.shape_cast %21 : vector<1x1x4x4xbf16> to vector<4x4xbf16>
    %cst_28 = arith.constant dense<0.000000e+00> : vector<6x4xf32>
    %23 = tpu.matmul %20, %22, %cst_28 {dimension_numbers = #tpu.dot_dimension_numbers<[1], [0], [0], [1], [0, 0, 1, 1], [], []>} : vector<6x4xbf16>, vector<4x4xbf16>, vector<6x4xf32> -> vector<6x4xf32>
    %24 = arith.addf %18, %23 : vector<6x4xf32>
    %c0_29 = arith.constant 0 : index
    %c0_30 = arith.constant 0 : index
    %c0_31 = arith.constant 0 : index
    %25 = vector.load %arg5[%c0_29, %c0_30, %c0_31] : memref<1x12x4xbf16, #tpu.memory_space<vmem>>, vector<1x6x4xbf16>
    %26 = vector.shape_cast %25 : vector<1x6x4xbf16> to vector<6x4xbf16>
    %c1_32 = arith.constant 1 : index
    %c1_33 = arith.constant 1 : index
    %c0_34 = arith.constant 0 : index
    %c0_35 = arith.constant 0 : index
    %27 = vector.load %arg6[%c1_32, %c1_33, %c0_34, %c0_35] : memref<3x3x4x4xbf16, #tpu.memory_space<vmem>>, vector<1x1x4x4xbf16>
    %28 = vector.shape_cast %27 : vector<1x1x4x4xbf16> to vector<4x4xbf16>
    %cst_36 = arith.constant dense<0.000000e+00> : vector<6x4xf32>
    %29 = tpu.matmul %26, %28, %cst_36 {dimension_numbers = #tpu.dot_dimension_numbers<[1], [0], [0], [1], [0, 0, 1, 1], [], []>} : vector<6x4xbf16>, vector<4x4xbf16>, vector<6x4xf32> -> vector<6x4xf32>
    %30 = arith.addf %24, %29 : vector<6x4xf32>
    %c0_37 = arith.constant 0 : index
    %c1_38 = arith.constant 1 : index
    %c0_39 = arith.constant 0 : index
    %31 = vector.load %arg4[%c0_37, %c1_38, %c0_39] : memref<1x12x4xbf16, #tpu.memory_space<vmem>>, vector<1x6x4xbf16>
    %32 = vector.shape_cast %31 : vector<1x6x4xbf16> to vector<6x4xbf16>
    %c1_40 = arith.constant 1 : index
    %c2_41 = arith.constant 2 : index
    %c0_42 = arith.constant 0 : index
    %c0_43 = arith.constant 0 : index
    %33 = vector.load %arg6[%c1_40, %c2_41, %c0_42, %c0_43] : memref<3x3x4x4xbf16, #tpu.memory_space<vmem>>, vector<1x1x4x4xbf16>
    %34 = vector.shape_cast %33 : vector<1x1x4x4xbf16> to vector<4x4xbf16>
    %cst_44 = arith.constant dense<0.000000e+00> : vector<6x4xf32>
    %35 = tpu.matmul %32, %34, %cst_44 {dimension_numbers = #tpu.dot_dimension_numbers<[1], [0], [0], [1], [0, 0, 1, 1], [], []>} : vector<6x4xbf16>, vector<4x4xbf16>, vector<6x4xf32> -> vector<6x4xf32>
    %36 = arith.addf %30, %35 : vector<6x4xf32>
    %c0_45 = arith.constant 0 : index
    %c3 = arith.constant 3 : index
    %c0_46 = arith.constant 0 : index
    %37 = vector.load %arg2[%c0_45, %c3, %c0_46] : memref<1x12x4xbf16, #tpu.memory_space<vmem>>, vector<1x6x4xbf16>
    %38 = vector.shape_cast %37 : vector<1x6x4xbf16> to vector<6x4xbf16>
    %c2_47 = arith.constant 2 : index
    %c0_48 = arith.constant 0 : index
    %c0_49 = arith.constant 0 : index
    %c0_50 = arith.constant 0 : index
    %39 = vector.load %arg6[%c2_47, %c0_48, %c0_49, %c0_50] : memref<3x3x4x4xbf16, #tpu.memory_space<vmem>>, vector<1x1x4x4xbf16>
    %40 = vector.shape_cast %39 : vector<1x1x4x4xbf16> to vector<4x4xbf16>
    %cst_51 = arith.constant dense<0.000000e+00> : vector<6x4xf32>
    %41 = tpu.matmul %38, %40, %cst_51 {dimension_numbers = #tpu.dot_dimension_numbers<[1], [0], [0], [1], [0, 0, 1, 1], [], []>} : vector<6x4xbf16>, vector<4x4xbf16>, vector<6x4xf32> -> vector<6x4xf32>
    %42 = arith.addf %36, %41 : vector<6x4xf32>
    %c0_52 = arith.constant 0 : index
    %c3_53 = arith.constant 3 : index
    %c0_54 = arith.constant 0 : index
    %43 = vector.load %arg3[%c0_52, %c3_53, %c0_54] : memref<1x12x4xbf16, #tpu.memory_space<vmem>>, vector<1x6x4xbf16>
    %44 = vector.shape_cast %43 : vector<1x6x4xbf16> to vector<6x4xbf16>
    %c2_55 = arith.constant 2 : index
    %c1_56 = arith.constant 1 : index
    %c0_57 = arith.constant 0 : index
    %c0_58 = arith.constant 0 : index
    %45 = vector.load %arg6[%c2_55, %c1_56, %c0_57, %c0_58] : memref<3x3x4x4xbf16, #tpu.memory_space<vmem>>, vector<1x1x4x4xbf16>
    %46 = vector.shape_cast %45 : vector<1x1x4x4xbf16> to vector<4x4xbf16>
    %cst_59 = arith.constant dense<0.000000e+00> : vector<6x4xf32>
    %47 = tpu.matmul %44, %46, %cst_59 {dimension_numbers = #tpu.dot_dimension_numbers<[1], [0], [0], [1], [0, 0, 1, 1], [], []>} : vector<6x4xbf16>, vector<4x4xbf16>, vector<6x4xf32> -> vector<6x4xf32>
    %48 = arith.addf %42, %47 : vector<6x4xf32>
    %c0_60 = arith.constant 0 : index
    %c4 = arith.constant 4 : index
    %c0_61 = arith.constant 0 : index
    %49 = vector.load %arg2[%c0_60, %c4, %c0_61] : memref<1x12x4xbf16, #tpu.memory_space<vmem>>, vector<1x6x4xbf16>
    %50 = vector.shape_cast %49 : vector<1x6x4xbf16> to vector<6x4xbf16>
    %c2_62 = arith.constant 2 : index
    %c2_63 = arith.constant 2 : index
    %c0_64 = arith.constant 0 : index
    %c0_65 = arith.constant 0 : index
    %51 = vector.load %arg6[%c2_62, %c2_63, %c0_64, %c0_65] : memref<3x3x4x4xbf16, #tpu.memory_space<vmem>>, vector<1x1x4x4xbf16>
    %52 = vector.shape_cast %51 : vector<1x1x4x4xbf16> to vector<4x4xbf16>
    %cst_66 = arith.constant dense<0.000000e+00> : vector<6x4xf32>
    %53 = tpu.matmul %50, %52, %cst_66 {dimension_numbers = #tpu.dot_dimension_numbers<[1], [0], [0], [1], [0, 0, 1, 1], [], []>} : vector<6x4xbf16>, vector<4x4xbf16>, vector<6x4xf32> -> vector<6x4xf32>
    %54 = arith.addf %48, %53 : vector<6x4xf32>
    %55 = arith.truncf %54 : vector<6x4xf32> to vector<6x4xbf16>
    %c0_67 = arith.constant 0 : index
    %c0_68 = arith.constant 0 : index
    %c0_69 = arith.constant 0 : index
    %56 = vector.load %arg7[%c0_67, %c0_68, %c0_69] : memref<1x6x4xbf16, #tpu.memory_space<vmem>>, vector<1x6x4xbf16>
    %57 = vector.shape_cast %56 : vector<1x6x4xbf16> to vector<6x4xbf16>
    %58 = vector.shape_cast %55 : vector<6x4xbf16> to vector<1x6x4xbf16>
    tpu.vector_store %arg7[%c0_67, %c0_68, %c0_69], %58 {strides = array<i32>} : memref<1x6x4xbf16, #tpu.memory_space<vmem>>, vector<1x6x4xbf16>,
    return
  }
  func.func @transform_0(%arg0: i32, %arg1: i32) -> (i32, i32, i32) {
    %c0_i32 = arith.constant 0 : i32
    %c0_i32_0 = arith.constant 0 : i32
    %c0_i32_1 = arith.constant 0 : i32
    return %arg0, %c0_i32, %c0_i32_0 : i32, i32, i32
  }
  func.func @transform_1(%arg0: i32, %arg1: i32) -> (i32, i32, i32) {
    %c0_i32 = arith.constant 0 : i32
    %c0_i32_0 = arith.constant 0 : i32
    %c0_i32_1 = arith.constant 0 : i32
    return %arg0, %c0_i32, %c0_i32_0 : i32, i32, i32
  }
  func.func @transform_2(%arg0: i32, %arg1: i32) -> (i32, i32, i32) {
    %c0_i32 = arith.constant 0 : i32
    %c0_i32_0 = arith.constant 0 : i32
    %c0_i32_1 = arith.constant 0 : i32
    return %arg0, %c0_i32, %c0_i32_0 : i32, i32, i32
  }
  func.func @transform_3(%arg0: i32, %arg1: i32) -> (i32, i32, i32) {
    %c0_i32 = arith.constant 0 : i32
    %c0_i32_0 = arith.constant 0 : i32
    %c0_i32_1 = arith.constant 0 : i32
    return %arg0, %c0_i32, %c0_i32_0 : i32, i32, i32
  }
  func.func @transform_4(%arg0: i32, %arg1: i32) -> (i32, i32, i32, i32) {
    %c0_i32 = arith.constant 0 : i32
    %c0_i32_0 = arith.constant 0 : i32
    %c0_i32_1 = arith.constant 0 : i32
    %c0_i32_2 = arith.constant 0 : i32
    return %c0_i32, %c0_i32_0, %c0_i32_1, %arg1 : i32, i32, i32, i32
  }
  func.func @transform_5(%arg0: i32, %arg1: i32) -> (i32, i32, i32) {
    %c0_i32 = arith.constant 0 : i32
    %c0_i32_0 = arith.constant 0 : i32
    return %arg0, %c0_i32, %arg1 : i32, i32, i32
  }
}

module attributes {stable_mosaic.version = 11 : i64} {
  func.func @_instnorm_lrelu_kernel(%arg0: i32, %arg1: i32, %arg2: memref<1x4x4xbf16, #tpu.memory_space<vmem>>, %arg3: memref<1x4x4xf32, #tpu.memory_space<vmem>>) attributes {dimension_semantics = [#tpu.dimension_semantics<parallel>, #tpu.dimension_semantics<parallel>], iteration_bounds = array<i64: 2, 1>, scalar_prefetch = 0 : i64, scratch_operands = 0 : i64, tpu.core_type = #tpu.core_type<tc>, window_params = [{transform_indices = @transform_0, window_bounds = array<i64: 1, 4, 4>}, {transform_indices = @transform_1, window_bounds = array<i64: 1, 4, 4>}]} {
    %c0 = arith.constant 0 : index
    %c0_0 = arith.constant 0 : index
    %c0_1 = arith.constant 0 : index
    %0 = vector.load %arg2[%c0, %c0_0, %c0_1] : memref<1x4x4xbf16, #tpu.memory_space<vmem>>, vector<1x4x4xbf16>
    %1 = arith.extf %0 : vector<1x4x4xbf16> to vector<1x4x4xf32>
    %cst = arith.constant dense<0.000000e+00> : vector<1x4xf32>
    %2 = vector.multi_reduction <add>, %1, %cst [1] : vector<1x4x4xf32> to vector<1x4xf32>
    %3 = vector.shape_cast %2 : vector<1x4xf32> to vector<1x1x4xf32>
    %cst_2 = arith.constant 4.000000e+00 : f32
    %4 = vector.broadcast %cst_2 : f32 to vector<1x1x4xf32>
    %5 = arith.divf %3, %4 : vector<1x1x4xf32>
    %6 = vector.broadcast %5 : vector<1x1x4xf32> to vector<1x4x4xf32>
    %7 = arith.subf %1, %6 : vector<1x4x4xf32>
    %8 = arith.mulf %7, %7 : vector<1x4x4xf32>
    %cst_3 = arith.constant dense<0.000000e+00> : vector<1x4xf32>
    %9 = vector.multi_reduction <add>, %8, %cst_3 [1] : vector<1x4x4xf32> to vector<1x4xf32>
    %10 = vector.shape_cast %9 : vector<1x4xf32> to vector<1x1x4xf32>
    %cst_4 = arith.constant 4.000000e+00 : f32
    %11 = vector.broadcast %cst_4 : f32 to vector<1x1x4xf32>
    %12 = arith.divf %10, %11 : vector<1x1x4xf32>
    %cst_5 = arith.constant 9.99999974E-6 : f32
    %13 = vector.broadcast %cst_5 : f32 to vector<1x1x4xf32>
    %14 = arith.addf %12, %13 : vector<1x1x4xf32>
    %15 = math.rsqrt %14 : vector<1x1x4xf32>
    %16 = vector.broadcast %15 : vector<1x1x4xf32> to vector<1x4x4xf32>
    %17 = arith.mulf %7, %16 : vector<1x4x4xf32>
    %cst_6 = arith.constant 0.000000e+00 : f32
    %18 = vector.broadcast %cst_6 : f32 to vector<1x4x4xf32>
    %19 = arith.cmpf oge, %17, %18 : vector<1x4x4xf32>
    %cst_7 = arith.constant 2.000000e-01 : f32
    %20 = vector.broadcast %cst_7 : f32 to vector<1x4x4xf32>
    %21 = arith.mulf %20, %17 : vector<1x4x4xf32>
    %22 = arith.select %19, %17, %21 : vector<1x4x4xi1>, vector<1x4x4xf32>
    %c0_8 = arith.constant 0 : index
    %c0_9 = arith.constant 0 : index
    %c0_10 = arith.constant 0 : index
    %23 = vector.load %arg3[%c0_8, %c0_9, %c0_10] : memref<1x4x4xf32, #tpu.memory_space<vmem>>, vector<1x4x4xf32>
    tpu.vector_store %arg3[%c0_8, %c0_9, %c0_10], %22 {strides = array<i32>} : memref<1x4x4xf32, #tpu.memory_space<vmem>>, vector<1x4x4xf32>,
    return
  }
  func.func @transform_0(%arg0: i32, %arg1: i32) -> (i32, i32, i32) {
    %c0_i32 = arith.constant 0 : i32
    %c0_i32_0 = arith.constant 0 : i32
    return %arg0, %c0_i32, %arg1 : i32, i32, i32
  }
  func.func @transform_1(%arg0: i32, %arg1: i32) -> (i32, i32, i32) {
    %c0_i32 = arith.constant 0 : i32
    %c0_i32_0 = arith.constant 0 : i32
    return %arg0, %c0_i32, %arg1 : i32, i32, i32
  }
}

</mosaic_0001>

<bundles_post_ra>
// kernel: unet_down_forward.5
= control target key start
LH: loop header
LB: loop body
LE: loop exit
PB: predicated region body
PF: predicated region fallthrough
CT: control target
= control target key end

     0   :  { %s1458_s18 = smov 0   ;;  %s1460_s19 = smov 0   ;;  %s1605_s0 = inlined_call_operand.vmem [shape: bf16[2,30,4], index: 0, kind: input, shape index: {}]   ;;  %s1606_s1 = inlined_call_operand.vmem [shape: bf16[2,30,4], index: 1, kind: input, shape index: {}]   ;;  %s1607_s2 = inlined_call_operand.vmem [shape: bf16[2,30,4], index: 2, kind: input, shape index: {}]   ;;  %s1608_s3 = inlined_call_operand.vmem [shape: bf16[2,30,4], index: 3, kind: input, shape index: {}]   ;;  %s1609_s4 = inlined_call_operand.vmem [shape: bf16[3,3,4,4], index: 4, kind: input, shape index: {}]   ;;  %s1610_s5 = inlined_call_operand.vmem [shape: bf16[2,20,4], index: 5, kind: output, shape index: {}]  }
   0x1   :  { %s1462_s20 = smov 0  }
   0x2 LB: > { %s27_s21 = sadd.s32 1, %s1422_s19  ;;  %p1180_p0 = scmp.ge.s32.totalorder %s1426_s20, 1  ;;  %s1426_s20 = sphi %s1462_s20, %s15_s20   ;;  %s1422_s19 = sphi %s1460_s19, %s1612_s19   ;;  %s1418_s18 = sphi %s1458_s18, %s1611_s18  }
   0x3   : > { %p29_p1 = scmp.ge.s32.totalorder %s27_s21, 2  ;;  %p240_p2 = scmp.lt.s32.totalorder %s1426_s20, 3 }
   0x5   : > { %s1614_s21 = smov (%p29_p1, %s27_s21), 0  ;;  %p241_p3 = pnand %p1180_p0, %p240_p2 }
   0x6   : > { %vm347_vm0 = vcmask (!%p241_p3), 1041408   ;;  %v1208_v0 = vld [vmem:[%s1609_s4 + $0x8] sm:$0x3] (!%p241_p3)  ;;  %v1190_v1 = vld [vmem:[%s1609_s4 + $0x2] sm:$0x3] (!%p241_p3)  ;;  %p290_p4 = scmp.lt.s32.totalorder (!%p241_p3), %s1418_s18, 1 }
   0x7   : > { %244 = sbr.rel (%p241_p3) target bundleno = 288 (0x120), region = 40  ;;  %1359 = vmatprep.subr.msk.bf16.mxu0 (!%p241_p3), %vm347_vm0, %v1208_v0  ;;  %1355 = vmatprep.subr.msk.bf16.mxu1 (!%p241_p3), %vm347_vm0, %v1190_v1  ;;  %v638_v2 = vsel (!%p241_p3), %vm347_vm0, %v1208_v0, 0  ;;  %v349_v3 = vsel (!%p241_p3), %vm347_vm0, %v1190_v1, 0  ;;  %v1213_v4 = vld [vmem:[%s1609_s4 + $0xa] sm:$0x3] (!%p241_p3)  ;;  %vm340_vm1 = vcmask (!%p241_p3), 31744  }
   0x8   : > { %1295 = vmatpush3.bf16.msra.mxu0 (!%p241_p3), %v638_v2  ;;  %1271 = vmatpush3.bf16.msra.mxu1 (!%p241_p3), %v349_v3  ;;  %v326_v5 = vld [vmem:[%s1609_s4] sm:$0x3] (!%p241_p3)  ;;  %v718_v6 = vsel (!%p241_p3), %vm347_vm0, %v1213_v4, 0  ;;  %v1217_v11 = vld [vmem:[%s1609_s4 + $0xc] sm:$0x3] (!%p241_p3)  ;;  %vm964_vm4 = vcmask (!%p241_p3), 1044480  }
   0x9   : > { %1360 = vmatprep.subr.msk.bf16.mxu0 (!%p241_p3), %vm347_vm0, %v1213_v4  ;;  %1356 = vmatprep.subr.msk.bf16.mxu1 (!%p241_p3), %vm347_vm0, %v326_v5  ;;  %v414_v8 = vsel (!%p241_p3), %vm347_vm0, %v326_v5, 0  ;;  %v1199_v14 = vld [vmem:[%s1609_s4 + $0x4] sm:$0x3] (!%p241_p3)  ;;  %vm470_vm2 = vsmask.f32 (!%p241_p3), 7424  ;;  %v812_v33 = vsel (!%p241_p3), %vm347_vm0, %v1217_v11, 0 }
   0xa   : > { %v492_v34 = vsel (!%p241_p3), %vm347_vm0, %v1199_v14, 0  ;;  %vm787_vm3 = vsmask.f32 (!%p241_p3), 5376  ;;  %v1222_v52 = vld [vmem:[%s1609_s4 + $0xe] sm:$0x3] (!%p241_p3)  ;;  %vm1044_vm5 = vcmask (!%p241_p3), 25600  }
   0xb   : > { %v1203_v57 = vld [vmem:[%s1609_s4 + $0x6] sm:$0x3] (!%p241_p3)  ;;  %v905_v4 = vsel (!%p241_p3), %vm347_vm0, %v1222_v52, 0  ;;  %vm1041_vm6 = vcmask (!%p241_p3), 27648  }
   0xc   : > { %v565_v5 = vsel (!%p241_p3), %vm347_vm0, %v1203_v57, 0 }
   0xe   : > { %s1616_s18 = smov (!%p290_p4, %s1418_s18), 1 }
   0xf   : > { %s1236_s30 = sshll.u32 %s1616_s18, 4  ;;  %s1364_s7 = smul.u32 12, %s1616_s18 }
  0x10   : > { %s1500_s8 = scalar_lea.vmem %s1606_s1, %s1236_s30  ;;  %s1506_s11 = scalar_lea.vmem %s1605_s0, %s1236_s30 }
  0x11   : > { %v1389_v7 = vld [vmem:[%s1500_s8] sm:$0xff]   ;;  %s309_s14 = scalar_lea.vmem %s1608_s3, %s1236_s30  ;;  %s1517_s17 = scalar_lea.vmem %s1607_s2, %s1236_s30  ;;  %v1392_v12 = vld [vmem:[%s1500_s8 + $0x8] ss:$0 sps:$4 sm:$0x33]  }
  0x12   : > { %1272 = vmatprep.mubr.msk.bf16.mxu1 %vm340_vm1, %v1389_v7  ;;  %v1390_v9 = vld [vmem:[%s309_s14] sm:$0xff]   ;;  %v1391_v10 = vld [vmem:[%s309_s14 + $0x8] ss:$0 sps:$4 sm:$0x33]   ;;  %s321_s10 = scalar_lea.vmem %s1610_s5, %s1364_s7 }
  0x13   : > { %v1393_v13 = vld [vmem:[%s1506_s11] sm:$0xff]   ;;  %1296 = vmatprep.mubr.msk.bf16.mxu0 %vm340_vm1, %v1390_v9  ;;  %1273 = vmatmul.mubr.msk.bf16.vlgmr.msra.gmra.mrb[0].mxu1 %vm340_vm1, %v1392_v12  ;;  %v1395_v16 = vld [vmem:[%s1517_s17 + $0x8] ss:$0 sps:$4 sm:$0x77]  }
  0x14   : > { %1297 = vmatmul.mubr.msk.bf16.vlgmr.msra.gmra.mrb[0].mxu0 %vm340_vm1, %v1391_v10  ;;  %v1531_v15 = vld [vmem:[%s1517_s17] sm:$0xff]   ;;  %1277 = vmatpush3.bf16.msra.mxu1 %v414_v8  ;;  %v471_v17 = vshrl.u32 %v1393_v13, 16  ;;  %v704_v20 = vshll.u32 %v1395_v16, 16  ;;  %v708_v21 = vshrl.u32 %v1395_v16, 16  ;;  %v473_v23 = vshll.u32 %v1393_v13, 16 }
  0x15   : > { %1301 = vmatpush3.bf16.msra.mxu0 %v718_v6  ;;  %1278 = vmatprep.mubr.msk.bf16.mxu1 %vm340_vm1, %v1393_v13  ;;  %v697_v18 = vshrl.u32 %v1531_v15, 16  ;;  %v699_v19 = vshll.u32 %v1531_v15, 16  ;;  %v1397_v22 = vld [vmem:[%s1506_s11 + $0x8] ss:$0 sps:$4 sm:$0x77]  }
  0x16   : > { %1361 = vmatprep.subr.msk.bf16.mxu0 %vm347_vm0, %v1217_v11  ;;  %1357 = vmatprep.subr.msk.bf16.mxu1 %vm347_vm0, %v1199_v14  ;;  %v771_v24 = vld [vmem:[%s1506_s11] sm:$0xc]  ;;  %v706_v26 = vrot.slane %v704_v20, 1  ;;  %v1542_v27 = vld [vmem:[%s1506_s11 + $0x4] sm:$0xf]  ;;  %v475_v28 = vrot.slane %v473_v23, 1 }
  0x17   : > { %v701_v25 = vrot.slane %v699_v19, 1  ;;  %v478_v29 = vshll.u32 %v1397_v22, 16  ;;  %v1218_v30 = vcombine.low %v771_v24, %v1542_v27  ;;  %v1396_v32 = vld [vmem:[%s1506_s11 + $0x8] ss:$0 sps:$4 sm:$0x33]   ;;  %v482_v0 = vshrl.u32 %v1397_v22, 16 }
  0x18   : > { %v1549_v35 = vld [vmem:[%s1506_s11 + $0x8] sm:$0x1f]   ;;  %v476_v36 = vor.u32 %v475_v28, %v471_v17  ;;  %v710_v41 = vor.u32 %v708_v21, %v706_v26  ;;  %v1400_v46 = vld [vmem:[%s1500_s8] sm:$0xfc]   ;;  %v1227_v8 = vld [vmem:[%s1609_s4 + $0x10] sm:$0x3] }
  0x19   : > { %v702_v31 = vor.u32 %v701_v25, %v697_v18  ;;  %v480_v37 = vrot.slane %v478_v29, 1  ;;  %v789_v38 = vshrl.u32 %v1218_v30, 16  ;;  %v792_v39 = vshll.u32 %v1218_v30, 16  ;;  %v1401_v47 = vld [vmem:[%s1500_s8 + $0x8] sm:$0x1f]  }
  0x1a   : > { %v797_v42 = vshrl.u32 %v1549_v35, 16  ;;  %v800_v43 = vshll.u32 %v1549_v35, 16  ;;  %v882_v53 = vshrl.u32 %v1400_v46, 16  ;;  %v885_v54 = vshll.u32 %v1400_v46, 16  ;;  %v958_v7 = vld [vmem:[%s1506_s11] sm:$0x8] }
  0x1b   : > { %v707_v40 = vsel %vm470_vm2, %v702_v31, %v706_v26  ;;  %v791_v44 = vrot.slane %v789_v38, 2  ;;  %v794_v45 = vrot.slane %v792_v39, 3  ;;  %v481_v48 = vsel %vm470_vm2, %v476_v36, %v480_v37  ;;  %v1402_v12 = vld [vmem:[%s1517_s17 + $0x8] ss:$0 sps:$4 sm:$0x33]  }
  0x1c   : > { %1302 = vmatprep.mubr.msk.bf16.mxu0 %vm340_vm1, %v707_v40  ;;  %v799_v49 = vrot.slane %v797_v42, 2  ;;  %v802_v50 = vrot.slane %v800_v43, 3  ;;  %v890_v55 = vshrl.u32 %v1401_v47, 16  ;;  %v893_v58 = vshll.u32 %v1401_v47, 16 }
  0x1d   : > { %v795_v51 = vor.u32 %v794_v45, %v791_v44  ;;  %v884_v60 = vrot.slane %v882_v53, 2  ;;  %v887_v61 = vrot.slane %v885_v54, 3  ;;  %v484_v3 = vor.u32 %v482_v0, %v480_v37 }
  0x1e   : > { %v803_v56 = vor.u32 %v802_v50, %v799_v49  ;;  %v892_v62 = vrot.slane %v890_v55, 2  ;;  %v895_v63 = vrot.slane %v893_v58, 3  ;;  %v1228_v9 = vcombine.low %v958_v7, %v1542_v27 }
  0x1f   : > { %1279 = vmatmul.mubr.msk.bf16.vlgmr.msra.gmra.mrb[0].mxu1 %vm340_vm1, %v1396_v32  ;;  %v888_v1 = vor.u32 %v887_v61, %v884_v60  ;;  %v966_v11 = vrot.slane %v1549_v35, 3  ;;  %v975_v13 = vsel %vm347_vm0, %v1227_v8, 0 }
  0x20   : > { %1303 = vmatmul.mubr.msk.bf16.vlgmr.msra.gmra.mrb[0].mxu0 %vm340_vm1, %v710_v41  ;;  %1283 = vmatpush3.bf16.msra.mxu1 %v492_v34  ;;  %v804_v59 = vsel %vm787_vm3, %v795_v51, %v803_v56  ;;  %v896_v2 = vor.u32 %v895_v63, %v892_v62  ;;  %v965_v10 = vrot.slane %v1228_v9, 3 }
  0x21   : > { %1307 = vmatpush3.bf16.msra.mxu0 %v812_v33  ;;  %1284 = vmatprep.mubr.msk.bf16.mxu1 %vm340_vm1, %v481_v48 }
  0x22   : > { %1362 = vmatprep.subr.msk.bf16.mxu0 %vm347_vm0, %v1222_v52  ;;  %1308 = vmatprep.mubr.msk.bf16.mxu0 %vm340_vm1, %v804_v59  ;;  %v897_v6 = vsel %vm787_vm3, %v888_v1, %v896_v2  ;;  %v967_v14 = vsel %vm964_vm4, %v965_v10, %v966_v11 }
  0x23   : > { %1358 = vmatprep.subr.msk.bf16.mxu1 %vm347_vm0, %v1203_v57 }
  0x2b   : > { %1285 = vmatmul.mubr.msk.bf16.vlgmr.msra.gmra.mrb[0].mxu1 %vm340_vm1, %v484_v3 }
  0x2c   : > { %1309 = vmatmul.mubr.msk.bf16.vlgmr.msra.gmra.mrb[0].mxu0 %vm340_vm1, %v803_v56  ;;  %1289 = vmatpush3.bf16.msra.mxu1 %v565_v5 }
  0x2d   : > { %1313 = vmatpush3.bf16.msra.mxu0 %v905_v4  ;;  %1290 = vmatprep.mubr.msk.bf16.mxu1 %vm340_vm1, %v1531_v15 }
  0x2e   : > { %1314 = vmatprep.mubr.msk.bf16.mxu0 %vm340_vm1, %v897_v6  ;;  %1363 = vmatprep.subr.msk.bf16.mxu0 %vm347_vm0, %v1227_v8 }
  0x37   : > { %1291 = vmatmul.mubr.msk.bf16.vlgmr.msra.gmra.mrb[0].mxu1 %vm340_vm1, %v1402_v12 }
  0x38   : > { %1315 = vmatmul.mubr.msk.bf16.vlgmr.msra.gmra.mrb[0].mxu0 %vm340_vm1, %v896_v2 }
  0x39   : > { %1319 = vmatpush3.bf16.msra.mxu0 %v975_v13  ;;  %1320 = vmatprep.mubr.msk.bf16.mxu0 %vm340_vm1, %v967_v14 }
  0x44   : > { %1321 = vmatmul.mubr.msk.bf16.vlgmr.msra.gmra.mrb[0].mxu0 %vm340_vm1, %v966_v11 }
 0x10a   : > { %v1292_v15 = vpop.f32.mrb[0].mxu1 }
 0x10b   : > { %v601_v16 = vpop.f32.mrb[1].mxu1 }
 0x10c   : > { %v1293_v17 = vpop.f32.mrb[2].mxu1 }
 0x10d   : > { %v604_v18 = vpop.f32.mrb[3].mxu1 }
 0x117   : > { %v1322_v19 = vpop.f32.mrb[0].mxu0 }
 0x118   : > { %v1324_v20 = vadd.f32 %v1322_v19, %v1292_v15  ;;  %v1011_v21 = vpop.f32.mrb[1].mxu0 }
 0x119   : > { %v1325_v22 = vadd.f32 %v1011_v21, %v601_v16  ;;  %v1323_v23 = vpop.f32.mrb[2].mxu0 }
 0x11a   : > { %v1242_v24 = vpack.c.bf16 %v1324_v20, %v1324_v20  ;;  %v1014_v25 = vpop.f32.mrb[3].mxu0 }
 0x11b   : > { %v1240_v26 = vpack.c.bf16 %v1325_v22, %v1325_v22  ;;  %v1326_v27 = vadd.f32 %v1014_v25, %v604_v18 }
 0x11c   : > { %1045 = vst.msk [vmem:[%s321_s10 + $0x8] sm:$0x3] %vm1044_vm5, %v1242_v24 }
 0x11d   : > { %1042 = vst.msk [vmem:[%s321_s10] sm:$0xf] %vm1041_vm6, %v1240_v26  ;;  %v1241_v28 = vpack.c.bf16 %v1326_v27, %v1326_v27 }
 0x11f   : > { %1043 = vst.msk [vmem:[%s321_s10 + $0x4] sm:$0xf] %vm1041_vm6, %v1241_v28 }
 0x120 PF: > { %s15_s20 = sadd.s32 1, %s1426_s20   ;;  %s1611_s18 = smov %s1422_s19 }
 0x121   : > { %p12_p5 = scmp.ge.s32.totalorder %s15_s20, 4   ;;  %s1612_s19 = smov %s1614_s21 }
 0x123   :  { %14 = sbr.rel (!%p12_p5) target bundleno = 2 (0x2), region = 90 }

// kernel: unet_down_forward.4
= control target key start
LH: loop header
LB: loop body
LE: loop exit
PB: predicated region body
PF: predicated region fallthrough
CT: control target
= control target key end

     0   :  { %s2483_s18 = smov 0   ;;  %s2485_s19 = smov 0   ;;  %s2893_s0 = inlined_call_operand.vmem [shape: bf16[2,90,4], index: 0, kind: input, shape index: {}]   ;;  %s2894_s1 = inlined_call_operand.vmem [shape: bf16[2,90,4], index: 1, kind: input, shape index: {}]   ;;  %s2895_s2 = inlined_call_operand.vmem [shape: bf16[2,90,4], index: 2, kind: input, shape index: {}]   ;;  %s2896_s3 = inlined_call_operand.vmem [shape: bf16[2,90,4], index: 3, kind: input, shape index: {}]   ;;  %s2897_s4 = inlined_call_operand.vmem [shape: bf16[3,3,4,4], index: 4, kind: input, shape index: {}]   ;;  %s2898_s5 = inlined_call_operand.vmem [shape: bf16[2,72,4], index: 5, kind: output, shape index: {}]  }
   0x1   :  { %s2487_s20 = smov 0  }
   0x2 LB: > { %s27_s21 = sadd.s32 1, %s2445_s19  ;;  %p1835_p0 = scmp.ge.s32.totalorder %s2449_s20, 1  ;;  %s2449_s20 = sphi %s2487_s20, %s15_s20   ;;  %s2445_s19 = sphi %s2485_s19, %s2900_s19   ;;  %s2441_s18 = sphi %s2483_s18, %s2899_s18  }
   0x3   : > { %p29_p1 = scmp.ge.s32.totalorder %s27_s21, 2  ;;  %p240_p2 = scmp.lt.s32.totalorder %s2449_s20, 3 }
   0x5   : > { %s2902_s21 = smov (%p29_p1, %s27_s21), 0  ;;  %p241_p3 = pnand %p1835_p0, %p240_p2 }
   0x6   : > { %vm383_vm0 = vcmask (!%p241_p3), 1041408   ;;  %v1884_v0 = vld [vmem:[%s2897_s4 + $0x8] sm:$0x3] (!%p241_p3)  ;;  %v1841_v1 = vld [vmem:[%s2897_s4 + $0x2] sm:$0x3] (!%p241_p3)  ;;  %v2451_v2 = vmov (!%p241_p3), 0.0  }
   0x7   : > { %244 = sbr.rel (%p241_p3) target bundleno = 413 (0x19d), region = 40  ;;  %2097 = vmatprep.subr.bf16.mxu0 (!%p241_p3), %v2451_v2  ;;  %2009 = vmatprep.subr.bf16.mxu1 (!%p241_p3), %v2451_v2  ;;  %v2510_v3 = vsel (!%p241_p3), %vm383_vm0, %v1884_v0, 0  ;;  %v385_v4 = vsel (!%p241_p3), %vm383_vm0, %v1841_v1, 0  ;;  %p290_p4 = scmp.lt.s32.totalorder (!%p241_p3), %s2441_s18, 1  ;;  %vm2452_vm1 = vmmov (!%p241_p3), 0   ;;  %vm367_vm2 = vcmask (!%p241_p3), 31744  }
   0x8   : > { %2098 = vmatpush3.bf16.msra.mxu0 (!%p241_p3), %v2510_v3  ;;  %2010 = vmatpush3.bf16.msra.mxu1 (!%p241_p3), %v385_v4  ;;  %v1895_v5 = vld [vmem:[%s2897_s4 + $0xa] sm:$0x3] (!%p241_p3)  ;;  %v332_v6 = vld [vmem:[%s2897_s4] sm:$0x3] (!%p241_p3)  ;;  %vm609_vm3 = vsmask.f32 (!%p241_p3), 7424 }
   0x9   : > { %2011 = vmatprep.mubr.msk.bf16.mxu1 (!%p241_p3), %vm2452_vm1, %v2451_v2  ;;  %2099 = vmatprep.mubr.msk.bf16.mxu0 (!%p241_p3), %vm2452_vm1, %v2451_v2  ;;  %v1106_v9 = vsel (!%p241_p3), %vm383_vm0, %v1895_v5, 0  ;;  %v498_v10 = vsel (!%p241_p3), %vm383_vm0, %v332_v6, 0  ;;  %v1906_v24 = vld [vmem:[%s2897_s4 + $0xc] sm:$0x3] (!%p241_p3)  ;;  %vm1545_vm4 = vcmask (!%p241_p3), 1046528   ;;  %vm1691_vm5 = vcmask (!%p241_p3), 27648  }
   0xa   : > { %2119 = vmatprep.subr.bf16.mxu0 (!%p241_p3), %v2451_v2  ;;  %2031 = vmatprep.subr.bf16.mxu1 (!%p241_p3), %v2451_v2  ;;  %v1281_v29 = vsel (!%p241_p3), %vm383_vm0, %v1906_v24, 0 }
   0xe   : > { %s2904_s18 = smov (!%p290_p4, %s2441_s18), 1 }
   0xf   : > { %s2358_s26 = smul.u32 48, %s2904_s18 }
  0x10   : > { %s2359_s7 = smul.u32 36, %s2904_s18 }
  0x11   : > { %s2529_s6 = scalar_lea.vmem %s2894_s1, %s2358_s26  ;;  %s2538_s11 = scalar_lea.vmem %s2896_s3, %s2358_s26 }
  0x12   : > { %v2386_v7 = vld [vmem:[%s2529_s6] sm:$0xff]   ;;  %v2388_v11 = vld [vmem:[%s2529_s6 + $0x8] sm:$0xff]   ;;  %s2554_s14 = scalar_lea.vmem %s2895_s2, %s2358_s26  ;;  %s2562_s17 = scalar_lea.vmem %s2893_s0, %s2358_s26  ;;  %v2390_v16 = vld [vmem:[%s2529_s6 + $0x10] sm:$0xff]  }
  0x13   : > { %v2387_v8 = vld [vmem:[%s2538_s11] sm:$0xff]   ;;  %2012 = vmatmul.mubr.msk.bf16.vlgmr.msra.gmra.mrb[0].mxu1 %vm367_vm2, %v2386_v7  ;;  %v2389_v12 = vld [vmem:[%s2538_s11 + $0x8] sm:$0xff]   ;;  %v2391_v17 = vld [vmem:[%s2538_s11 + $0x10] sm:$0xff]   ;;  %s2864_s10 = scalar_lea.vmem %s2898_s5, %s2359_s7 }
  0x14   : > { %2100 = vmatmul.mubr.msk.bf16.vlgmr.msra.gmra.mrb[0].mxu0 %vm367_vm2, %v2387_v8  ;;  %2015 = vmatprep.mubr.msk.bf16.mxu1 %vm2452_vm1, %v2451_v2  ;;  %v2393_v13 = vld [vmem:[%s2554_s14] sm:$0xff]   ;;  %v2394_v14 = vld [vmem:[%s2554_s14 + $0x8] sm:$0xff]   ;;  %v2396_v21 = vld [vmem:[%s2554_s14 + $0x10] sm:$0xff]  }
  0x15   : > { %2120 = vmatpush3.bf16.msra.mxu0 %v1106_v9  ;;  %2103 = vmatprep.mubr.msk.bf16.mxu0 %vm2452_vm1, %v2451_v2  ;;  %v1054_v15 = vshll.u32 %v2393_v13, 16  ;;  %v1052_v18 = vshrl.u32 %v2393_v13, 16  ;;  %v1059_v20 = vshll.u32 %v2394_v14, 16  ;;  %v2392_v25 = vld [vmem:[%s2529_s6 + $0x18] sm:$0xff]   ;;  %v1067_v26 = vshll.u32 %v2396_v21, 16  ;;  %v2410_v33 = vld [vmem:[%s2562_s17 + $0x10] sm:$0xff]  }
  0x16   : > { %2032 = vmatpush3.bf16.msra.mxu1 %v498_v10  ;;  %2141 = vmatprep.subr.bf16.mxu0 %v2451_v2  ;;  %v1063_v28 = vshrl.u32 %v2394_v14, 16  ;;  %v2587_v30 = vld [vmem:[%s2554_s14 + $0x18] sm:$0xff]   ;;  %v1071_v32 = vshrl.u32 %v2396_v21, 16  ;;  %v2395_v37 = vld [vmem:[%s2529_s6 + $0x20] ss:$0 sps:$4 sm:$0xff]   ;;  %v626_v39 = vshll.u32 %v2410_v33, 16 }
  0x17   : > { %2053 = vmatprep.subr.bf16.mxu1 %v2451_v2  ;;  %v1056_v19 = vrot.slane %v1054_v15, 1  ;;  %v1061_v23 = vrot.slane %v1059_v20, 1  ;;  %v2590_v31 = vld [vmem:[%s2562_s17 + $0x1c] sm:$0xff]   ;;  %v1069_v35 = vrot.slane %v1067_v26, 1  ;;  %v2603_v40 = vld [vmem:[%s2562_s17 + $0x24] sm:$0x1f]  }
  0x18   : > { %v2412_v34 = vld [vmem:[%s2562_s17 + $0x18] sm:$0xff]   ;;  %v1250_v36 = vshll.u32 %v2590_v31, 16  ;;  %v1254_v41 = vshrl.u32 %v2590_v31, 16  ;;  %v630_v43 = vshrl.u32 %v2410_v33, 16  ;;  %v2414_v45 = vld [vmem:[%s2529_s6 + $0x4] sm:$0xff]   ;;  %v1075_v46 = vshll.u32 %v2587_v30, 16 }
  0x19   : > { %v1057_v22 = vor.u32 %v1056_v19, %v1052_v18  ;;  %v1065_v38 = vor.u32 %v1063_v28, %v1061_v23  ;;  %v634_v44 = vshll.u32 %v2412_v34, 16  ;;  %v2611_v47 = vrot.slane %v626_v39, 1  ;;  %v2415_v49 = vld [vmem:[%s2529_s6 + $0xc] sm:$0xff]   ;;  %v2616_v50 = vld [vmem:[%s2554_s14 + $0x20] sm:$0x1f]   ;;  %v2416_v4 = vld [vmem:[%s2529_s6 + $0x14] sm:$0xff]  }
  0x1a   : > { %v2607_v42 = vrot.slane %v1250_v36, 1  ;;  %v1258_v48 = vshll.u32 %v2603_v40, 16  ;;  %v2620_v53 = vld [vmem:[%s2562_s17 + $0x20] sm:$0x1f]   ;;  %v638_v54 = vshrl.u32 %v2412_v34, 16  ;;  %v1402_v58 = vshrl.u32 %v2414_v45, 16 }
  0x1b   : > { %2016 = vmatmul.mubr.msk.bf16.gmra.mrb[4].mxu1 %vm367_vm2, %v2388_v11  ;;  %v1062_v27 = vsel %vm609_vm3, %v1057_v22, %v1061_v23  ;;  %v636_v52 = vrot.slane %v634_v44, 1  ;;  %v1070_v55 = vsel %vm609_vm3, %v1065_v38, %v1069_v35  ;;  %v632_v57 = vor.u32 %v630_v43, %v2611_v47  ;;  %v2397_v9 = vld [vmem:[%s2562_s17] sm:$0xff]   ;;  %v2670_v33 = vld [vmem:[%s2562_s17 + $0x14] sm:$0xff]  }
  0x1c   : > { %2104 = vmatmul.mubr.msk.bf16.gmra.mrb[4].mxu0 %vm367_vm2, %v2389_v12  ;;  %2019 = vmatprep.mubr.msk.bf16.mxu1 %vm2452_vm1, %v2451_v2  ;;  %v1256_v51 = vor.u32 %v1254_v41, %v2607_v42  ;;  %v2623_v56 = vrot.slane %v1258_v48, 1  ;;  %v642_v60 = vshll.u32 %v2620_v53, 16  ;;  %v1404_v61 = vshll.u32 %v2414_v45, 16  ;;  %v1862_v10 = vld [vmem:[%s2897_s4 + $0x4] sm:$0x3]  ;;  %v2418_v14 = vld [vmem:[%s2529_s6 + $0x1c] sm:$0xff]  }
  0x1d   : > { %2107 = vmatprep.mubr.msk.bf16.mxu0 %vm2452_vm1, %v2451_v2  ;;  %v640_v59 = vor.u32 %v638_v54, %v636_v52  ;;  %v1073_v62 = vor.u32 %v1071_v32, %v1069_v35  ;;  %v2633_v0 = vsel %vm609_vm3, %v632_v57, %v636_v52  ;;  %v1409_v1 = vshll.u32 %v2415_v49, 16  ;;  %v2659_v24 = vld [vmem:[%s2529_s6 + $0x24] sm:$0x1f]   ;;  %v2667_v32 = vld [vmem:[%s2562_s17 + $0xc] sm:$0xff]  }
  0x1e   : > { %v2630_v63 = vsel %vm609_vm3, %v1256_v51, %v2623_v56  ;;  %v1077_v5 = vrot.slane %v1075_v46, 1  ;;  %v2639_v6 = vrot.slane %v642_v60, 1  ;;  %v1406_v7 = vrot.slane %v1404_v61, 1  ;;  %v1539_v38 = vld [vmem:[%s2562_s17 + $0x4] sm:$0xe]  ;;  %v2399_v54 = vld [vmem:[%s2562_s17 + $0x8] sm:$0xff]  }
  0x1f   : > { %v1413_v8 = vshrl.u32 %v2415_v49, 16  ;;  %v1079_v11 = vshrl.u32 %v2587_v30, 16  ;;  %v1411_v12 = vrot.slane %v1409_v1, 1  ;;  %v1417_v13 = vshll.u32 %v2416_v4, 16  ;;  %v1189_v48 = vld [vmem:[%s2562_s17 + $0x4] sm:$0xf] }
  0x20   : > { %v1083_v15 = vshll.u32 %v2616_v50, 16  ;;  %v1421_v18 = vshrl.u32 %v2416_v4, 16  ;;  %v1425_v21 = vshll.u32 %v2418_v14, 16  ;;  %v1078_v22 = vsel %vm609_vm3, %v1073_v62, %v1077_v5  ;;  %v2401_v1 = vld [vmem:[%s2562_s17 + $0x10] sm:$0xff]  }
  0x21   : > { %v1415_v19 = vor.u32 %v1413_v8, %v1411_v12  ;;  %v1419_v20 = vrot.slane %v1417_v13, 1  ;;  %v665_v30 = vsel %vm383_vm0, %v1862_v10, 0  ;;  %v1433_v34 = vshll.u32 %v2659_v24, 16  ;;  %v2402_v10 = vld [vmem:[%s2562_s17 + $0x18] sm:$0xff]  }
  0x22   : > { %v1427_v28 = vrot.slane %v1425_v21, 1  ;;  %v1085_v35 = vrot.slane %v1083_v15, 1  ;;  %v1547_v43 = vrot.slane %v2667_v32, 1  ;;  %v1549_v44 = vrot.slane %v2670_v33, 1 }
  0x23   : > { %2020 = vmatmul.mubr.msk.bf16.gmra.mrb[8].mxu1 %vm367_vm2, %v2390_v16  ;;  %v2652_v16 = vsel %vm609_vm3, %v640_v59, %v2639_v6  ;;  %v2663_v26 = vsel %vm609_vm3, %v1415_v19, %v1419_v20  ;;  %v2681_v39 = vrot.slane %v1433_v34, 1  ;;  %v1081_v45 = vor.u32 %v1079_v11, %v1077_v5  ;;  %v1917_v11 = vld [vmem:[%s2897_s4 + $0xe] sm:$0x3] }
  0x24   : > { %2108 = vmatmul.mubr.msk.bf16.gmra.mrb[8].mxu0 %vm367_vm2, %v2391_v17  ;;  %2023 = vmatprep.mubr.msk.bf16.mxu1 %vm2452_vm1, %v2451_v2  ;;  %v1407_v17 = vor.u32 %v1406_v7, %v1402_v58  ;;  %v1551_v46 = vrot.slane %v2590_v31, 1  ;;  %v2694_v52 = vsel %vm1545_vm4, %v1547_v43, %v1549_v44  ;;  %v1553_v57 = vrot.slane %v2603_v40, 1 }
  0x25   : > { %2121 = vmatprep.mubr.msk.bf16.mxu0 %vm2452_vm1, %v2451_v2  ;;  %v1086_v31 = vsel %vm609_vm3, %v1081_v45, %v1085_v35  ;;  %v1087_v61 = vshrl.u32 %v2616_v50, 16  ;;  %v1234_v8 = vshll.u32 %v2667_v32, 16  ;;  %v1242_v15 = vshll.u32 %v2670_v33, 16 }
  0x26   : > { %v2656_v23 = vsel %vm609_vm3, %v1407_v17, %v1411_v12  ;;  %v2705_v60 = vsel %vm1545_vm4, %v1551_v46, %v1553_v57  ;;  %v2407_v12 = vld [vmem:[%s2562_s17] sm:$0xff]   ;;  %v1456_v17 = vsel %vm383_vm0, %v1917_v11, 0 }
  0x27   : > { %v1089_v4 = vor.u32 %v1087_v61, %v1085_v35  ;;  %v613_v19 = vshll.u32 %v2407_v12, 16  ;;  %v1244_v21 = vrot.slane %v1242_v15, 1 }
  0x2b   : > { %2024 = vmatmul.mubr.msk.bf16.gmra.mrb[12].mxu1 %vm367_vm2, %v2392_v25  ;;  %v1190_v25 = vld [vmem:[%s2562_s17 + $0x8] sm:$0xf] }
  0x2c   : > { %2122 = vmatmul.mubr.msk.bf16.vlgmr.msra.gmra.mrb[0].mxu0 %vm367_vm2, %v1062_v27  ;;  %2027 = vmatprep.mubr.msk.bf16.mxu1 %vm2452_vm1, %v2451_v2  ;;  %v1423_v27 = vor.u32 %v1421_v18, %v1419_v20  ;;  %v1929_v41 = vcombine.low %v1539_v38, %v1190_v25  ;;  %v1907_v59 = vcombine.low %v1189_v48, %v1190_v25  ;;  %v2408_v18 = vld [vmem:[%s2562_s17 + $0x8] sm:$0xff]   ;;  %v611_v25 = vshrl.u32 %v2407_v12, 16 }
  0x2d   : > { %2142 = vmatpush3.bf16.msra.mxu0 %v1281_v29  ;;  %2125 = vmatprep.mubr.msk.bf16.mxu0 %vm2452_vm1, %v2451_v2  ;;  %v1429_v29 = vshrl.u32 %v2418_v14, 16  ;;  %v1238_v14 = vshrl.u32 %v2667_v32, 16 }
  0x2e   : > { %2163 = vmatprep.subr.bf16.mxu0 %v2451_v2  ;;  %v2675_v36 = vsel %vm609_vm3, %v1423_v27, %v1427_v28  ;;  %v1546_v51 = vrot.slane %v1929_v41, 1  ;;  %v1229_v62 = vshll.u32 %v1907_v59, 16  ;;  %v1227_v5 = vshrl.u32 %v1907_v59, 16 }
  0x2f   : > { %v615_v27 = vrot.slane %v613_v19, 1 }
  0x30   : > { %v2700_v58 = vsel %vm1545_vm4, %v1546_v51, %v1547_v43  ;;  %v1231_v7 = vrot.slane %v1229_v62, 1 }
  0x31   : > { %v616_v32 = vor.u32 %v615_v27, %v611_v25 }
  0x32   : > { %v1232_v50 = vor.u32 %v1231_v7, %v1227_v5 }
  0x33   : > { %2028 = vmatmul.mubr.msk.bf16.gmra.mrb[16].mxu1 %vm367_vm2, %v2395_v37  ;;  %v1431_v37 = vor.u32 %v1429_v29, %v1427_v28  ;;  %v618_v28 = vshll.u32 %v2408_v18, 16 }
  0x34   : > { %2126 = vmatmul.mubr.msk.bf16.gmra.mrb[4].mxu0 %vm367_vm2, %v1070_v55  ;;  %2033 = vmatprep.mubr.msk.bf16.mxu1 %vm2452_vm1, %v2451_v2  ;;  %v2697_v55 = vsel %vm1545_vm4, %v1549_v44, %v1551_v46 }
  0x35   : > { %2129 = vmatprep.mubr.msk.bf16.mxu0 %vm2452_vm1, %v2451_v2  ;;  %v2692_v49 = vsel %vm609_vm3, %v1431_v37, %v2681_v39  ;;  %v620_v34 = vrot.slane %v618_v28, 1  ;;  %v1873_v37 = vld [vmem:[%s2897_s4 + $0x6] sm:$0x3] }
  0x36   : > { %v798_v43 = vsel %vm383_vm0, %v1873_v37, 0 }
  0x37   : > { %v621_v38 = vsel %vm609_vm3, %v616_v32, %v620_v34 }
  0x3b   : > { %2034 = vmatmul.mubr.msk.bf16.vlgmr.msra.gmra.mrb[0].mxu1 %vm367_vm2, %v2397_v9  ;;  %v1236_v9 = vrot.slane %v1234_v8, 1 }
  0x3c   : > { %2130 = vmatmul.mubr.msk.bf16.gmra.mrb[8].mxu0 %vm367_vm2, %v1078_v22  ;;  %2037 = vmatprep.mubr.msk.bf16.mxu1 %vm2452_vm1, %v2451_v2  ;;  %v2405_v22 = vld [vmem:[%s2562_s17 + $0x20] ss:$0 sps:$4 sm:$0xff]  }
  0x3d   : > { %2133 = vmatprep.mubr.msk.bf16.mxu0 %vm2452_vm1, %v2451_v2  ;;  %2054 = vmatpush3.bf16.msra.mxu1 %v665_v30  ;;  %v1237_v13 = vsel %vm609_vm3, %v1232_v50, %v1236_v9  ;;  %v1240_v20 = vor.u32 %v1238_v14, %v1236_v9  ;;  %v1246_v30 = vshrl.u32 %v2670_v33, 16  ;;  %v622_v33 = vshrl.u32 %v2408_v18, 16 }
  0x3e   : > { %2075 = vmatprep.subr.bf16.mxu1 %v2451_v2 }
  0x3f   : > { %v1245_v29 = vsel %vm609_vm3, %v1240_v20, %v1244_v21  ;;  %v1248_v35 = vor.u32 %v1246_v30, %v1244_v21  ;;  %v624_v44 = vor.u32 %v622_v33, %v620_v34 }
  0x41   : > { %v1253_v41 = vsel %vm609_vm3, %v1248_v35, %v2607_v42  ;;  %v629_v45 = vsel %vm609_vm3, %v624_v44, %v2611_v47  ;;  %v1262_v42 = vshrl.u32 %v2603_v40, 16  ;;  %v1928_v47 = vld [vmem:[%s2897_s4 + $0x10] sm:$0x3] }
  0x43   : > { %2038 = vmatmul.mubr.msk.bf16.gmra.mrb[4].mxu1 %vm367_vm2, %v2399_v54  ;;  %v1264_v46 = vor.u32 %v1262_v42, %v2623_v56  ;;  %v646_v56 = vshrl.u32 %v2620_v53, 16  ;;  %v2417_v53 = vld [vmem:[%s2554_s14] sm:$0xff]  }
  0x44   : > { %2134 = vmatmul.mubr.msk.bf16.gmra.mrb[12].mxu0 %vm367_vm2, %v1086_v31  ;;  %2041 = vmatprep.mubr.msk.bf16.mxu1 %vm2452_vm1, %v2451_v2 }
  0x45   : > { %2137 = vmatprep.mubr.msk.bf16.mxu0 %vm2452_vm1, %v2451_v2 }
  0x4b   : > { %2042 = vmatmul.mubr.msk.bf16.gmra.mrb[8].mxu1 %vm367_vm2, %v2401_v1 }
  0x4c   : > { %2138 = vmatmul.mubr.msk.bf16.gmra.mrb[16].mxu0 %vm367_vm2, %v1089_v4  ;;  %2045 = vmatprep.mubr.msk.bf16.mxu1 %vm2452_vm1, %v2451_v2 }
  0x4d   : > { %2143 = vmatprep.mubr.msk.bf16.mxu0 %vm2452_vm1, %v2451_v2 }
  0x53   : > { %2046 = vmatmul.mubr.msk.bf16.gmra.mrb[12].mxu1 %vm367_vm2, %v2402_v10 }
  0x54   : > { %2144 = vmatmul.mubr.msk.bf16.vlgmr.msra.gmra.mrb[0].mxu0 %vm367_vm2, %v1237_v13  ;;  %2049 = vmatprep.mubr.msk.bf16.mxu1 %vm2452_vm1, %v2451_v2 }
  0x55   : > { %2164 = vmatpush3.bf16.msra.mxu0 %v1456_v17  ;;  %2147 = vmatprep.mubr.msk.bf16.mxu0 %vm2452_vm1, %v2451_v2 }
  0x56   : > { %2185 = vmatprep.subr.bf16.mxu0 %v2451_v2 }
  0x5b   : > { %2050 = vmatmul.mubr.msk.bf16.gmra.mrb[16].mxu1 %vm367_vm2, %v2405_v22 }
  0x5c   : > { %2148 = vmatmul.mubr.msk.bf16.gmra.mrb[4].mxu0 %vm367_vm2, %v1245_v29  ;;  %2055 = vmatprep.mubr.msk.bf16.mxu1 %vm2452_vm1, %v2451_v2 }
  0x5d   : > { %2151 = vmatprep.mubr.msk.bf16.mxu0 %vm2452_vm1, %v2451_v2 }
  0x63   : > { %2056 = vmatmul.mubr.msk.bf16.vlgmr.msra.gmra.mrb[0].mxu1 %vm367_vm2, %v621_v38 }
  0x64   : > { %2152 = vmatmul.mubr.msk.bf16.gmra.mrb[8].mxu0 %vm367_vm2, %v1253_v41  ;;  %2059 = vmatprep.mubr.msk.bf16.mxu1 %vm2452_vm1, %v2451_v2 }
  0x65   : > { %2155 = vmatprep.mubr.msk.bf16.mxu0 %vm2452_vm1, %v2451_v2  ;;  %2076 = vmatpush3.bf16.msra.mxu1 %v798_v43 }
  0x66   : > { %2207 = vmatprep.subr.bf16.mxu1 %v2451_v2 }
  0x6b   : > { %2060 = vmatmul.mubr.msk.bf16.gmra.mrb[4].mxu1 %vm367_vm2, %v629_v45 }
  0x6c   : > { %2156 = vmatmul.mubr.msk.bf16.gmra.mrb[12].mxu0 %vm367_vm2, %v2630_v63  ;;  %2063 = vmatprep.mubr.msk.bf16.mxu1 %vm2452_vm1, %v2451_v2  ;;  %v1571_v63 = vsel %vm383_vm0, %v1928_v47, 0 }
  0x6d   : > { %2159 = vmatprep.mubr.msk.bf16.mxu0 %vm2452_vm1, %v2451_v2 }
  0x73   : > { %2064 = vmatmul.mubr.msk.bf16.gmra.mrb[8].mxu1 %vm367_vm2, %v2633_v0  ;;  %v648_v0 = vor.u32 %v646_v56, %v2639_v6  ;;  %v2419_v6 = vld [vmem:[%s2554_s14 + $0x8] sm:$0xff]  }
  0x74   : > { %2160 = vmatmul.mubr.msk.bf16.gmra.mrb[16].mxu0 %vm367_vm2, %v1264_v46  ;;  %2067 = vmatprep.mubr.msk.bf16.mxu1 %vm2452_vm1, %v2451_v2 }
  0x75   : > { %2165 = vmatprep.mubr.msk.bf16.mxu0 %vm2452_vm1, %v2451_v2 }
  0x7b   : > { %2068 = vmatmul.mubr.msk.bf16.gmra.mrb[12].mxu1 %vm367_vm2, %v2652_v16  ;;  %v1437_v16 = vshrl.u32 %v2659_v24, 16  ;;  %v2424_v24 = vld [vmem:[%s2554_s14 + $0x20] ss:$0 sps:$4 sm:$0xff]  }
  0x7c   : > { %2166 = vmatmul.mubr.msk.bf16.vlgmr.msra.gmra.mrb[0].mxu0 %vm367_vm2, %v2656_v23  ;;  %2071 = vmatprep.mubr.msk.bf16.mxu1 %vm2452_vm1, %v2451_v2  ;;  %v2421_v23 = vld [vmem:[%s2554_s14 + $0x10] sm:$0xff]  }
  0x7d   : > { %2186 = vmatpush3.bf16.msra.mxu0 %v1571_v63  ;;  %2169 = vmatprep.mubr.msk.bf16.mxu0 %vm2452_vm1, %v2451_v2 }
  0x83   : > { %2072 = vmatmul.mubr.msk.bf16.gmra.mrb[16].mxu1 %vm367_vm2, %v648_v0 }
  0x84   : > { %2170 = vmatmul.mubr.msk.bf16.gmra.mrb[4].mxu0 %vm367_vm2, %v2663_v26  ;;  %2077 = vmatprep.mubr.msk.bf16.mxu1 %vm2452_vm1, %v2451_v2  ;;  %v1439_v26 = vor.u32 %v1437_v16, %v2681_v39  ;;  %v2426_v39 = vld [vmem:[%s2538_s11 + $0x20] ss:$0 sps:$4 sm:$0xff]  }
  0x85   : > { %2173 = vmatprep.mubr.msk.bf16.mxu0 %vm2452_vm1, %v2451_v2 }
  0x8b   : > { %2078 = vmatmul.mubr.msk.bf16.vlgmr.msra.gmra.mrb[0].mxu1 %vm367_vm2, %v2417_v53 }
  0x8c   : > { %2174 = vmatmul.mubr.msk.bf16.gmra.mrb[8].mxu0 %vm367_vm2, %v2675_v36  ;;  %2081 = vmatprep.mubr.msk.bf16.mxu1 %vm2452_vm1, %v2451_v2  ;;  %v2425_v36 = vld [vmem:[%s2538_s11 + $0x18] sm:$0xff]  }
  0x8d   : > { %2177 = vmatprep.mubr.msk.bf16.mxu0 %vm2452_vm1, %v2451_v2  ;;  %2208 = vmatpush3.bf16.msra.mxu1 %v2510_v3  ;;  %v2422_v3 = vld [vmem:[%s2554_s14 + $0x18] sm:$0xff]  }
  0x93   : > { %2082 = vmatmul.mubr.msk.bf16.gmra.mrb[4].mxu1 %vm367_vm2, %v2419_v6 }
  0x94   : > { %2178 = vmatmul.mubr.msk.bf16.gmra.mrb[12].mxu0 %vm367_vm2, %v2692_v49  ;;  %2085 = vmatprep.mubr.msk.bf16.mxu1 %vm2452_vm1, %v2451_v2 }
  0x95   : > { %2181 = vmatprep.mubr.msk.bf16.mxu0 %vm2452_vm1, %v2451_v2 }
  0x9b   : > { %2086 = vmatmul.mubr.msk.bf16.gmra.mrb[8].mxu1 %vm367_vm2, %v2421_v23 }
  0x9c   : > { %2182 = vmatmul.mubr.msk.bf16.gmra.mrb[16].mxu0 %vm367_vm2, %v1439_v26  ;;  %2089 = vmatprep.mubr.msk.bf16.mxu1 %vm2452_vm1, %v2451_v2 }
  0x9d   : > { %2187 = vmatprep.mubr.msk.bf16.mxu0 %vm2452_vm1, %v2451_v2 }
  0xa3   : > { %2090 = vmatmul.mubr.msk.bf16.gmra.mrb[12].mxu1 %vm367_vm2, %v2422_v3 }
  0xa4   : > { %2188 = vmatmul.mubr.msk.bf16.vlgmr.msra.gmra.mrb[0].mxu0 %vm367_vm2, %v2700_v58  ;;  %2093 = vmatprep.mubr.msk.bf16.mxu1 %vm2452_vm1, %v2451_v2 }
  0xa5   : > { %2191 = vmatprep.mubr.msk.bf16.mxu0 %vm2452_vm1, %v2451_v2 }
  0xab   : > { %2094 = vmatmul.mubr.msk.bf16.gmra.mrb[16].mxu1 %vm367_vm2, %v2424_v24 }
  0xac   : > { %2192 = vmatmul.mubr.msk.bf16.gmra.mrb[4].mxu0 %vm367_vm2, %v2694_v52  ;;  %2111 = vmatprep.mubr.msk.bf16.mxu1 %vm2452_vm1, %v2451_v2 }
  0xad   : > { %2195 = vmatprep.mubr.msk.bf16.mxu0 %vm2452_vm1, %v2451_v2 }
  0xb3   : > { %2112 = vmatmul.mubr.msk.bf16.vlgmr.msra.gmra.mrb[12].mxu1 %vm367_vm2, %v2425_v36 }
  0xb4   : > { %2196 = vmatmul.mubr.msk.bf16.gmra.mrb[8].mxu0 %vm367_vm2, %v2697_v55  ;;  %2115 = vmatprep.mubr.msk.bf16.mxu1 %vm2452_vm1, %v2451_v2 }
  0xb5   : > { %2199 = vmatprep.mubr.msk.bf16.mxu0 %vm2452_vm1, %v2451_v2 }
  0xbb   : > { %2116 = vmatmul.mubr.msk.bf16.gmra.mrb[16].mxu1 %vm367_vm2, %v2426_v39 }
  0xbc   : > { %2200 = vmatmul.mubr.msk.bf16.gmra.mrb[12].mxu0 %vm367_vm2, %v2705_v60 }
  0xbd   : > { %2203 = vmatprep.mubr.msk.bf16.mxu0 %vm2452_vm1, %v2451_v2 }
  0xc4   : > { %2204 = vmatmul.mubr.msk.bf16.gmra.mrb[16].mxu0 %vm367_vm2, %v1553_v57 }
 0x15e   : > { %v834_v48 = vpop.f32.mrb[0].mxu1 }
 0x15f   : > { %v2079_v49 = vpop.f32.mrb[1].mxu1 }
 0x160   : > { %v837_v51 = vpop.f32.mrb[2].mxu1 }
 0x161   : > { %v2080_v52 = vpop.f32.mrb[3].mxu1 }
 0x166   : > { %v842_v54 = vpop.f32.mrb[4].mxu1 }
 0x167   : > { %v2083_v55 = vpop.f32.mrb[5].mxu1 }
 0x168   : > { %v845_v58 = vpop.f32.mrb[6].mxu1 }
 0x169   : > { %v2084_v31 = vpop.f32.mrb[7].mxu1 }
 0x16e   : > { %v850_v59 = vpop.f32.mrb[8].mxu1 }
 0x16f   : > { %v2087_v61 = vpop.f32.mrb[9].mxu1 }
 0x170   : > { %v853_v62 = vpop.f32.mrb[10].mxu1 }
 0x171   : > { %v2088_v1 = vpop.f32.mrb[11].mxu1 }
 0x177   : > { %v1607_v60 = vpop.f32.mrb[0].mxu0 }
 0x178   : > { %v2209_v4 = vadd.f32 %v1607_v60, %v834_v48  ;;  %v2189_v2 = vpop.f32.mrb[1].mxu0 }
 0x179   : > { %v1610_v40 = vpop.f32.mrb[2].mxu0 }
 0x17a   : > { %v1946_v57 = vpack.c.bf16 %v2209_v4, %v2209_v4  ;;  %v2210_v5 = vadd.f32 %v1610_v40, %v837_v51  ;;  %v2190_v7 = vpop.f32.mrb[3].mxu0 }
 0x17c   : > { %1692 = vst.msk [vmem:[%s2864_s10] sm:$0xf] %vm1691_vm5, %v1946_v57  ;;  %v1947_v8 = vpack.c.bf16 %v2210_v5, %v2210_v5 }
 0x17e   : > { %1693 = vst.msk [vmem:[%s2864_s10 + $0x4] sm:$0xf] %vm1691_vm5, %v1947_v8 }
 0x17f   : > { %v1615_v50 = vpop.f32.mrb[4].mxu0 }
 0x180   : > { %v2211_v9 = vadd.f32 %v1615_v50, %v842_v54  ;;  %v2193_v10 = vpop.f32.mrb[5].mxu0 }
 0x181   : > { %v1618_v11 = vpop.f32.mrb[6].mxu0 }
 0x182   : > { %v1948_v12 = vpack.c.bf16 %v2211_v9, %v2211_v9  ;;  %v2212_v13 = vadd.f32 %v1618_v11, %v845_v58  ;;  %v2194_v14 = vpop.f32.mrb[7].mxu0 }
 0x184   : > { %1694 = vst.msk [vmem:[%s2864_s10 + $0x8] sm:$0xf] %vm1691_vm5, %v1948_v12  ;;  %v1949_v15 = vpack.c.bf16 %v2212_v13, %v2212_v13 }
 0x186   : > { %1695 = vst.msk [vmem:[%s2864_s10 + $0xc] sm:$0xf] %vm1691_vm5, %v1949_v15  ;;  %v991_v17 = vpop.f32.mrb[12].mxu1 }
 0x187   : > { %v1623_v18 = vpop.f32.mrb[8].mxu0  ;;  %v2113_v19 = vpop.f32.mrb[13].mxu1 }
 0x188   : > { %v2213_v20 = vadd.f32 %v1623_v18, %v850_v59  ;;  %v2197_v21 = vpop.f32.mrb[9].mxu0  ;;  %v994_v22 = vpop.f32.mrb[14].mxu1 }
 0x189   : > { %v1626_v25 = vpop.f32.mrb[10].mxu0  ;;  %v2114_v27 = vpop.f32.mrb[15].mxu1 }
 0x18a   : > { %v1950_v28 = vpack.c.bf16 %v2213_v20, %v2213_v20  ;;  %v2214_v29 = vadd.f32 %v1626_v25, %v853_v62  ;;  %v2198_v30 = vpop.f32.mrb[11].mxu0 }
 0x18c   : > { %1696 = vst.msk [vmem:[%s2864_s10 + $0x10] sm:$0xf] %vm1691_vm5, %v1950_v28  ;;  %v1951_v32 = vpack.c.bf16 %v2214_v29, %v2214_v29 }
 0x18e   : > { %1697 = vst.msk [vmem:[%s2864_s10 + $0x14] sm:$0xf] %vm1691_vm5, %v1951_v32  ;;  %v999_v34 = vpop.f32.mrb[16].mxu1 }
 0x18f   : > { %v1631_v35 = vpop.f32.mrb[12].mxu0  ;;  %v2117_v37 = vpop.f32.mrb[17].mxu1 }
 0x190   : > { %v2215_v38 = vadd.f32 %v1631_v35, %v991_v17  ;;  %v2201_v33 = vpop.f32.mrb[13].mxu0  ;;  %v1002_v41 = vpop.f32.mrb[18].mxu1 }
 0x191   : > { %v1634_v43 = vpop.f32.mrb[14].mxu0  ;;  %v2118_v44 = vpop.f32.mrb[19].mxu1 }
 0x192   : > { %v1952_v45 = vpack.c.bf16 %v2215_v38, %v2215_v38  ;;  %v2216_v42 = vadd.f32 %v1634_v43, %v994_v22  ;;  %v2202_v46 = vpop.f32.mrb[15].mxu0 }
 0x194   : > { %1698 = vst.msk [vmem:[%s2864_s10 + $0x18] sm:$0xf] %vm1691_vm5, %v1952_v45  ;;  %v1953_v47 = vpack.c.bf16 %v2216_v42, %v2216_v42 }
 0x196   : > { %1699 = vst.msk [vmem:[%s2864_s10 + $0x1c] sm:$0xf] %vm1691_vm5, %v1953_v47 }
 0x197   : > { %v1639_v63 = vpop.f32.mrb[16].mxu0 }
 0x198   : > { %v2217_v56 = vadd.f32 %v1639_v63, %v999_v34  ;;  %v2205_v0 = vpop.f32.mrb[17].mxu0 }
 0x199   : > { %v1642_v53 = vpop.f32.mrb[18].mxu0 }
 0x19a   : > { %v1954_v6 = vpack.c.bf16 %v2217_v56, %v2217_v56  ;;  %v2206_v16 = vpop.f32.mrb[19].mxu0 }
 0x19c   : > { %1700 = vst.msk [vmem:[%s2864_s10 + $0x20] sm:$0xf] %vm1691_vm5, %v1954_v6 }
 0x19d PF: > { %s15_s20 = sadd.s32 1, %s2449_s20   ;;  %s2899_s18 = smov %s2445_s19 }
 0x19e   : > { %p12_p5 = scmp.ge.s32.totalorder %s15_s20, 4   ;;  %s2900_s19 = smov %s2902_s21 }
 0x1a0   :  { %14 = sbr.rel (!%p12_p5) target bundleno = 2 (0x2), region = 90 }

// kernel: unet_down_forward.6
= control target key start
LH: loop header
LB: loop body
LE: loop exit
PB: predicated region body
PF: predicated region fallthrough
CT: control target
= control target key end

     0   :  { %s1179_s18 = smov 0   ;;  %s1181_s19 = smov 0   ;;  %s1312_s0 = inlined_call_operand.vmem [shape: bf16[2,12,4], index: 0, kind: input, shape index: {}]   ;;  %s1313_s1 = inlined_call_operand.vmem [shape: bf16[2,12,4], index: 1, kind: input, shape index: {}]   ;;  %s1314_s2 = inlined_call_operand.vmem [shape: bf16[2,12,4], index: 2, kind: input, shape index: {}]   ;;  %s1315_s3 = inlined_call_operand.vmem [shape: bf16[2,12,4], index: 3, kind: input, shape index: {}]   ;;  %s1316_s4 = inlined_call_operand.vmem [shape: bf16[3,3,4,4], index: 4, kind: input, shape index: {}]   ;;  %s1317_s5 = inlined_call_operand.vmem [shape: bf16[2,6,4], index: 5, kind: output, shape index: {}]  }
   0x1   :  { %s1183_s20 = smov 0  }
   0x2 LB: > { %s27_s21 = sadd.s32 1, %s1141_s19  ;;  %p953_p0 = scmp.ge.s32.totalorder %s1145_s20, 1  ;;  %s1145_s20 = sphi %s1183_s20, %s15_s20   ;;  %s1141_s19 = sphi %s1181_s19, %s1319_s19   ;;  %s1137_s18 = sphi %s1179_s18, %s1318_s18  }
   0x3   : > { %p29_p1 = scmp.ge.s32.totalorder %s27_s21, 2  ;;  %p240_p2 = scmp.lt.s32.totalorder %s1145_s20, 3 }
   0x5   : > { %s1321_s21 = smov (%p29_p1, %s27_s21), 0  ;;  %p241_p3 = pnand %p953_p0, %p240_p2 }
   0x6   : > { %vm330_vm0 = vcmask (!%p241_p3), 1041408   ;;  %v971_v0 = vld [vmem:[%s1316_s4 + $0x8] sm:$0x3] (!%p241_p3)  ;;  %v963_v1 = vld [vmem:[%s1316_s4 + $0x2] sm:$0x3] (!%p241_p3)  ;;  %v1147_v2 = vmov (!%p241_p3), 0.0  }
   0x7   : > { %244 = sbr.rel (%p241_p3) target bundleno = 285 (0x11d), region = 40  ;;  %1033 = vmatprep.subr.bf16.mxu0 (!%p241_p3), %v1147_v2  ;;  %1009 = vmatprep.subr.bf16.mxu1 (!%p241_p3), %v1147_v2  ;;  %v537_v3 = vsel (!%p241_p3), %vm330_vm0, %v971_v0, 0  ;;  %v332_v4 = vsel (!%p241_p3), %vm330_vm0, %v963_v1, 0  ;;  %p289_p4 = scmp.lt.s32.totalorder (!%p241_p3), %s1137_s18, 1  ;;  %vm1148_vm1 = vmmov (!%p241_p3), 0   ;;  %vm326_vm2 = vcmask (!%p241_p3), 31744  }
   0x8   : > { %1034 = vmatpush3.bf16.msra.mxu0 (!%p241_p3), %v537_v3  ;;  %1010 = vmatpush3.bf16.msra.mxu1 (!%p241_p3), %v332_v4  ;;  %v322_v5 = vld [vmem:[%s1316_s4] sm:$0x3] (!%p241_p3)  ;;  %v973_v6 = vld [vmem:[%s1316_s4 + $0xa] sm:$0x3] (!%p241_p3)  ;;  %v966_v15 = vld [vmem:[%s1316_s4 + $0x4] sm:$0x3] (!%p241_p3) }
   0x9   : > { %1011 = vmatprep.mubr.msk.bf16.mxu1 (!%p241_p3), %vm1148_vm1, %v1147_v2  ;;  %1035 = vmatprep.mubr.msk.bf16.mxu0 (!%p241_p3), %vm1148_vm1, %v1147_v2  ;;  %v378_v7 = vsel (!%p241_p3), %vm330_vm0, %v322_v5, 0  ;;  %v597_v10 = vsel (!%p241_p3), %vm330_vm0, %v973_v6, 0  ;;  %v976_v20 = vld [vmem:[%s1316_s4 + $0xc] sm:$0x3] (!%p241_p3)  ;;  %v437_v22 = vsel (!%p241_p3), %vm330_vm0, %v966_v15, 0  ;;  %vm823_vm3 = vcmask (!%p241_p3), 26624  }
   0xa   : > { %1039 = vmatprep.subr.bf16.mxu0 (!%p241_p3), %v1147_v2  ;;  %1015 = vmatprep.subr.bf16.mxu1 (!%p241_p3), %v1147_v2  ;;  %v661_v24 = vsel (!%p241_p3), %vm330_vm0, %v976_v20, 0  ;;  %v969_v32 = vld [vmem:[%s1316_s4 + $0x6] sm:$0x3] (!%p241_p3)  ;;  %v979_v34 = vld [vmem:[%s1316_s4 + $0xe] sm:$0x3] (!%p241_p3) }
   0xb   : > { %v487_v37 = vsel (!%p241_p3), %vm330_vm0, %v969_v32, 0  ;;  %v725_v38 = vsel (!%p241_p3), %vm330_vm0, %v979_v34, 0  ;;  %v982_v44 = vld [vmem:[%s1316_s4 + $0x10] sm:$0x3] (!%p241_p3) }
   0xc   : > { %v779_v46 = vsel (!%p241_p3), %vm330_vm0, %v982_v44, 0 }
   0xe   : > { %s1323_s18 = smov (!%p289_p4, %s1137_s18), 1 }
   0xf   : > { %s987_s28 = sshll.u32 %s1323_s18, 3  ;;  %s962_s7 = sshll.u32 %s1323_s18, 2 }
  0x10   : > { %s1225_s8 = scalar_lea.vmem %s1313_s1, %s987_s28  ;;  %s1230_s11 = scalar_lea.vmem %s1314_s2, %s987_s28 }
  0x11   : > { %v323_v8 = vld [vmem:[%s1225_s8] sm:$0x7]  ;;  %s308_s14 = scalar_lea.vmem %s1315_s3, %s987_s28  ;;  %s1245_s17 = scalar_lea.vmem %s1312_s0, %s987_s28 }
  0x12   : > { %v1118_v9 = vld [vmem:[%s1230_s11] ss:$0 sps:$4 sm:$0xff]   ;;  %1012 = vmatmul.mubr.msk.bf16.vlgmr.msra.gmra.mrb[0].mxu1 %vm326_vm2, %v323_v8  ;;  %v640_v16 = vld [vmem:[%s1245_s17] sm:$0xe]  ;;  %v641_v17 = vld [vmem:[%s1245_s17 + $0x4] sm:$0x1]  ;;  %s319_s10 = scalar_lea.vmem %s1317_s5, %s962_s7 }
  0x13   : > { %v530_v11 = vld [vmem:[%s308_s14] sm:$0x7]  ;;  %1016 = vmatpush3.bf16.msra.mxu1 %v378_v7  ;;  %1017 = vmatprep.mubr.msk.bf16.mxu1 %vm1148_vm1, %v1147_v2  ;;  %v589_v12 = vshll.u32 %v1118_v9, 16  ;;  %v587_v13 = vshrl.u32 %v1118_v9, 16  ;;  %v977_v23 = vcombine.low %v640_v16, %v641_v17 }
  0x14   : > { %1036 = vmatmul.mubr.msk.bf16.vlgmr.msra.gmra.mrb[0].mxu0 %vm326_vm2, %v530_v11  ;;  %1021 = vmatprep.subr.bf16.mxu1 %v1147_v2  ;;  %v1120_v18 = vld [vmem:[%s1245_s17] ss:$0 sps:$4 sm:$0xff]   ;;  %v1119_v35 = vld [vmem:[%s1225_s8] sm:$0x1e]  }
  0x15   : > { %1040 = vmatpush3.bf16.msra.mxu0 %v597_v10  ;;  %1041 = vmatprep.mubr.msk.bf16.mxu0 %vm1148_vm1, %v1147_v2  ;;  %v591_v14 = vrot.slane %v589_v12, 1  ;;  %v321_v19 = vld [vmem:[%s1245_s17] sm:$0x7]  ;;  %v429_v25 = vshll.u32 %v1120_v18, 16  ;;  %v650_v26 = vshrl.u32 %v977_v23, 16  ;;  %v653_v27 = vshll.u32 %v977_v23, 16 }
  0x16   : > { %1045 = vmatprep.subr.bf16.mxu0 %v1147_v2  ;;  %v427_v28 = vshrl.u32 %v1120_v18, 16  ;;  %v714_v39 = vshrl.u32 %v1119_v35, 16  ;;  %v717_v40 = vshll.u32 %v1119_v35, 16  ;;  %v480_v43 = vld [vmem:[%s1230_s11] sm:$0x7] }
  0x17   : > { %v592_v21 = vor.u32 %v591_v14, %v587_v13  ;;  %v431_v29 = vrot.slane %v429_v25, 1  ;;  %v652_v30 = vrot.slane %v650_v26, 1  ;;  %v655_v31 = vrot.slane %v653_v27, 2  ;;  %v768_v47 = vld [vmem:[%s1245_s17] sm:$0xc] }
  0x18   : > { %v716_v41 = vrot.slane %v714_v39, 1  ;;  %v719_v42 = vrot.slane %v717_v40, 2  ;;  %v983_v48 = vcombine.low %v768_v47, %v641_v17 }
  0x19   : > { %v432_v33 = vor.u32 %v431_v29, %v427_v28  ;;  %v656_v36 = vor.u32 %v655_v31, %v652_v30 }
  0x1a   : > { %v720_v45 = vor.u32 %v719_v42, %v716_v41  ;;  %v774_v49 = vrot.slane %v983_v48, 2 }
  0x1e   : > { %1018 = vmatmul.mubr.msk.bf16.vlgmr.msra.gmra.mrb[0].mxu1 %vm326_vm2, %v321_v19 }
  0x1f   : > { %1022 = vmatpush3.bf16.msra.mxu1 %v437_v22  ;;  %1023 = vmatprep.mubr.msk.bf16.mxu1 %vm1148_vm1, %v1147_v2 }
  0x20   : > { %1042 = vmatmul.mubr.msk.bf16.vlgmr.msra.gmra.mrb[0].mxu0 %vm326_vm2, %v592_v21  ;;  %1027 = vmatprep.subr.bf16.mxu1 %v1147_v2 }
  0x21   : > { %1046 = vmatpush3.bf16.msra.mxu0 %v661_v24  ;;  %1047 = vmatprep.mubr.msk.bf16.mxu0 %vm1148_vm1, %v1147_v2 }
  0x22   : > { %1051 = vmatprep.subr.bf16.mxu0 %v1147_v2 }
  0x2a   : > { %1024 = vmatmul.mubr.msk.bf16.vlgmr.msra.gmra.mrb[0].mxu1 %vm326_vm2, %v432_v33 }
  0x2b   : > { %1028 = vmatpush3.bf16.msra.mxu1 %v487_v37  ;;  %1029 = vmatprep.mubr.msk.bf16.mxu1 %vm1148_vm1, %v1147_v2 }
  0x2c   : > { %1048 = vmatmul.mubr.msk.bf16.vlgmr.msra.gmra.mrb[0].mxu0 %vm326_vm2, %v656_v36 }
  0x2d   : > { %1052 = vmatpush3.bf16.msra.mxu0 %v725_v38  ;;  %1053 = vmatprep.mubr.msk.bf16.mxu0 %vm1148_vm1, %v1147_v2 }
  0x2e   : > { %1057 = vmatprep.subr.bf16.mxu0 %v1147_v2 }
  0x36   : > { %1030 = vmatmul.mubr.msk.bf16.vlgmr.msra.gmra.mrb[0].mxu1 %vm326_vm2, %v480_v43 }
  0x38   : > { %1054 = vmatmul.mubr.msk.bf16.vlgmr.msra.gmra.mrb[0].mxu0 %vm326_vm2, %v720_v45 }
  0x39   : > { %1058 = vmatpush3.bf16.msra.mxu0 %v779_v46  ;;  %1059 = vmatprep.mubr.msk.bf16.mxu0 %vm1148_vm1, %v1147_v2 }
  0x44   : > { %1060 = vmatmul.mubr.msk.bf16.vlgmr.msra.gmra.mrb[0].mxu0 %vm326_vm2, %v774_v49 }
 0x109   : > { %v523_v50 = vpop.f32.mrb[0].mxu1 }
 0x10a   : > { %v1031_v51 = vpop.f32.mrb[1].mxu1 }
 0x10b   : > { %v526_v52 = vpop.f32.mrb[2].mxu1 }
 0x10c   : > { %v1032_v53 = vpop.f32.mrb[3].mxu1 }
 0x117   : > { %v815_v54 = vpop.f32.mrb[0].mxu0 }
 0x118   : > { %v1063_v55 = vadd.f32 %v815_v54, %v523_v50  ;;  %v1061_v56 = vpop.f32.mrb[1].mxu0 }
 0x119   : > { %v818_v57 = vpop.f32.mrb[2].mxu0 }
 0x11a   : > { %v822_v58 = vpack.c.bf16 %v1063_v55, %v1063_v55  ;;  %v1062_v59 = vpop.f32.mrb[3].mxu0 }
 0x11c   : > { %824 = vst.msk [vmem:[%s319_s10] sm:$0x7] %vm823_vm3, %v822_v58 }
 0x11d PF: > { %s15_s20 = sadd.s32 1, %s1145_s20   ;;  %s1318_s18 = smov %s1141_s19 }
 0x11e   : > { %p12_p5 = scmp.ge.s32.totalorder %s15_s20, 4   ;;  %s1319_s19 = smov %s1321_s21 }
 0x120   :  { %14 = sbr.rel (!%p12_p5) target bundleno = 2 (0x2), region = 90 }

// kernel: unet_down_forward.7
= control target key start
LH: loop header
LB: loop body
LE: loop exit
PB: predicated region body
PF: predicated region fallthrough
CT: control target
= control target key end

     0   :  { %6 = vsyncpa [#allocation3], 0  ;;  %s526_s0 = inlined_call_operand.vmem [shape: bf16[2,4,4], index: 0, kind: input, shape index: {}]   ;;  %s527_s1 = inlined_call_operand.hbm [shape: f32[2,4,4], index: 1, kind: output, shape index: {}]  }
   0x1   :  { %8 = vsyncpa [#allocation3 + $0x1], 0  ;;  %s411_s6 = smov 0   ;;  %s413_s7 = smov 0  }
   0x2   :  { %s415_s8 = smov 0   ;;  %s417_s9 = smov 0  }
   0x3   :  { %s419_s10 = smov 0   ;;  %s421_s11 = smov 0  }
   0x4 LB: > { %s252_s12 = sadd.s32 4294967295, %s398_s11   ;;  %s253_s13 = sadd.s32 4294967294, %s398_s11   ;;  %s398_s11 = sphi %s421_s11, %s14_s11   ;;  %s394_s10 = sphi %s419_s10, %s534_s10   ;;  %s390_s9 = sphi %s417_s9, %s533_s9   ;;  %s386_s8 = sphi %s415_s8, %s532_s8   ;;  %s382_s7 = sphi %s413_s7, %s531_s7   ;;  %s378_s6 = sphi %s411_s6, %s530_s6  }
   0x5   : > { %s26_s14 = sadd.s32 1, %s394_s10  ;;  %s63_s15 = sadd.s32 1, %s386_s8 }
   0x6   : > { %p28_p0 = scmp.ge.s32.totalorder %s26_s14, 2  ;;  %p73_p1 = scmp.ne.s32.totalorder %s386_s8, %s382_s7 }
   0x7   : > { %p74_p2 = scmp.eq.s32.totalorder %s252_s12, 1  ;;  %p79_p3 = scmp.ne.s32.totalorder %s382_s7, %s378_s6 }
   0x8   : > { %s536_s14 = smov (%p28_p0, %s26_s14), 0  ;;  %p80_p5 = scmp.eq.s32.totalorder %s253_s13, 1 }
   0x9   : > { %p451_p4 = por %p74_p2, %p73_p1  ;;  %s58_s17 = ssub.s32 %s394_s10, %s536_s14 }
   0xa   : > { %p256_p6 = scmp.ge.s32.totalorder %s398_s11, 1  ;;  %p61_p7 = scmp.eq.s32.totalorder %s58_s17, 0 }
   0xb   : > { %p458_p8 = por %p80_p5, %p79_p3  ;;  %p108_p9 = scmp.lt.s32.totalorder %s398_s11, 3 }
   0xc   : > { %s464_s19 = scalar_select %p61_p7, %s386_s8, %s63_s15  }
   0xd   : > { %p109_p10 = pnand %p256_p6, %p108_p9 }
   0xe   : > { %p130_p11 = scmp.lt.s32.totalorder (!%p109_p10), %s390_s9, 1  ;;  %vm139_vm0 = vcmask (!%p109_p10), 27648   ;;  %s127_s25 = sand.u32 (!%p109_p10), 1, %s382_s7  }
   0xf   : > { %112 = sbr.rel (%p109_p10) target bundleno = 95 (0x5f), region = 24  ;;  %s257_s26 = sshll.u32 (!%p109_p10), %s127_s25, 2 }
  0x10   : > { %s129_s27 = scalar_lea.vmem (!%p109_p10), [#allocation2], %s257_s26  ;;  %s260_s29 = sshll.u32 (!%p109_p10), %s390_s9, 6 }
  0x11   : > { %s181_s28 = sshll.u32 (!%p109_p10), %s129_s27, 4  ;;  %s480_s3 = scalar_lea.hbm (!%p109_p10), %s527_s1, %s260_s29  ;;  %s475_s28 = int_to_ptr.vmem [resolvable:$true] %s181_s28 }
  0x12   : > { %s167_s4 = scalar_lea.sflag (!%p109_p10), [#allocation3], %s127_s25  ;;  %s320_s5 = scalar_lea.vmem (!%p109_p10), %s475_s28, 64 }
  0x13   : > { %p321_p12 = scmp.ne.s32.totalorder (!%p109_p10), %s475_s28, %s320_s5 }
  0x15   : > { %p322_p13 = pnand (!%p109_p10), %p321_p12, %p451_p4 }
  0x16   : > { %s131_s20 = scalar_select %p130_p11, %s390_s9, 1 }
  0x17   : > { %p323_p0 = pneg %p322_p13  ;;  %s400_s9 = smov [#allocation2]  }
  0x18   : > { %s258_s21 = sshll.u32 %s131_s20, 1  ;;  %s324_s12 = sshll.u32 %s400_s9, 4  ;;  %s325_s12 = int_to_ptr.vmem [resolvable:$false] %s324_s12 }
  0x19   : > { %s136_s24 = scalar_lea.vmem %s526_s0, %s258_s21  ;;  %s326_s13 = scalar_lea.vmem %s325_s12, 128 }
  0x1a   : > { %v137_v0 = vld [vmem:[%s136_s24] sm:$0x3]  ;;  %p327_p1 = scmp.lt.s32.totalorder %s475_s28, %s325_s12  ;;  %p328_p2 = scmp.lt.s32.totalorder %s326_s13, %s320_s5 }
  0x1b   : > { %v138_v1 = vunpack.c.l.bf16 %v137_v0 }
  0x1c   : > { %p329_p3 = por %p328_p2, %p327_p1 }
  0x1d   : > { %v140_v2 = vsel %vm139_vm0, %v138_v1, 0.0 }
  0x1e   : > { %v141_v3 = vrot.slane %v140_v2, 4  ;;  %p330_p5 = pnand %p329_p3, %p323_p0 }
  0x20   : > { %v142_v4 = vadd.f32 %v141_v3, %v140_v2 }
  0x22   : > { %v143_v5 = vrot.slane %v142_v4, 2 }
  0x24   : > { %v144_v6 = vadd.f32 %v143_v5, %v142_v4 }
  0x26   : > { %v145_v7 = vrot.slane %v144_v6, 1 }
  0x28   : > { %v146_v8 = vadd.f32 %v145_v7, %v144_v6 }
  0x2a   : > { %v148_v9 = vmul.f32 0.25, %v146_v8 }
  0x2c   : > { %v149_v10 = vsub.f32 %v138_v1, %v148_v9 }
  0x2e   : > { %v150_v11 = vmul.f32 %v149_v10, %v149_v10 }
  0x30   : > { %v151_v12 = vsel %vm139_vm0, %v150_v11, 0.0 }
  0x31   : > { %v152_v13 = vrot.slane %v151_v12, 4 }
  0x33   : > { %v153_v14 = vadd.f32 %v152_v13, %v151_v12 }
  0x35   : > { %v154_v15 = vrot.slane %v153_v14, 2 }
  0x37   : > { %v155_v16 = vadd.f32 %v154_v15, %v153_v14 }
  0x39   : > { %v156_v17 = vrot.slane %v155_v16, 1 }
  0x3b   : > { %v157_v18 = vadd.f32 %v156_v17, %v155_v16 }
  0x3d   : > { %v158_v19 = vmul.f32 0.25, %v157_v18 }
  0x3f   : > { %v159_v20 = vadd.f32 1e-05, %v158_v19 }
  0x41   : > { %318 = vrsqrt.f32 %v159_v20 }
  0x4b   : > { %v319_v21 = vpop.eup %318 }
  0x4c   : > { %v161_v22 = vmul.f32 %v319_v21, %v149_v10 }
  0x4e   : > { %vm162_vm1 = vcmp.ge.f32.partialorder %v161_v22, 0.0  ;;  %v163_v23 = vmul.f32 0.2, %v161_v22 }
  0x50   : > { %v164_v24 = vsel %vm162_vm1, %v161_v22, %v163_v23 }
  0x51   : > { %165 = vst.msk [vmem:[%s129_s27] sm:$0xf] %vm139_vm0, %v164_v24 }
  0x52   : > { %333 = shalt.err (!%p330_p5)
}
  0x53   : > { %s334_s15 = scalar_lea.hbm %s480_s3, 64  ;;  %s338_s21 = scalar_lea.hbm %s527_s1, 128 }
  0x54   : > { %p335_p6 = scmp.ne.s32.totalorder %s480_s3, %s334_s15  ;;  %p339_p10 = scmp.lt.u32.totalorder %s480_s3, %s527_s1 }
  0x55   : > { %p340_p11 = scmp.lt.u32.totalorder %s338_s21, %s334_s15  ;;  %p342_p13 = scmp.lt.u32.totalorder %s334_s15, %s480_s3 }
  0x56   : > { %p336_p7 = pnand %p335_p6, %p451_p4 }
  0x57   : > { %p341_p12 = por %p340_p11, %p339_p10 }
  0x58   : > { %p337_p9 = pneg %p336_p7 }
  0x59   : > { %p343_p0 = por %p342_p13, %p341_p12 }
  0x5b   : > { %p344_p1 = pnand %p343_p0, %p337_p9 }
  0x5d   : > { %347 = shalt.err (!%p344_p1)
}
  0x5e   : > { %263 = dma.vmem_to_hbm [thread:$0]  (%p451_p4), %s475_s28, 64, %s480_s3, %s167_s4  }
  0x5f PF: > { %p269_p2 = scmp.ge.s32.totalorder %s398_s11, 2  ;;  %s193_s24 = sand.u32 1, %s378_s6  }
  0x60   : > { %s194_s25 = scalar_lea.sflag [#allocation3], %s193_s24 }
  0x61   : > { %p266_p3 = pnand %p269_p2, %p458_p8 }
  0x63   : > { %373 = dma.done.wait (!%p266_p3), %s194_s25, 64  }
  0x64   : > { %375 = vsyncadd (!%p266_p3), %s194_s25, 4294967232  ;;  %s14_s11 = sadd.s32 1, %s398_s11   ;;  %s530_s6 = smov %s382_s7 }
  0x65   : > { %p11_p5 = scmp.ge.s32.totalorder %s14_s11, 4   ;;  %s531_s7 = smov %s386_s8 }
  0x66   : > { %s532_s8 = smov %s464_s19  ;;  %s533_s9 = smov %s394_s10 }
  0x67   : > { %s534_s10 = smov %s536_s14  ;;  %13 = sbr.rel (!%p11_p5) target bundleno = 4 (0x4), region = 59 }
  0x6e   :  { %199 = vsyncpa [#allocation3], 1 }
  0x6f   :  { %201 = vsyncpa [#allocation3 + $0x1], 1 }

</bundles_post_ra>
